<compile_context>
chip_gen: v7x
topology: tpu7x:2x2x1
jax: 0.10.0
libtpu: 0.0.40
codegen_flags: <defaults>
</compile_context>

<pallas_src>
import functools

import jax
import jax.numpy as jnp
from jax.experimental import pallas as pl
from jax.experimental.pallas import tpu as pltpu


# ----------------------------------------------------------------------------
# helpers
# ----------------------------------------------------------------------------
def _rup(x, m):
    return ((x + m - 1) // m) * m


def _pick_tile(total, base, cap):
    """Largest power-of-2 multiple of `base` that divides `total`, capped at `cap`."""
    t = base
    while t * 2 <= cap and total % (t * 2) == 0:
        t *= 2
    return t


# ----------------------------------------------------------------------------
# Pallas kernels
# ----------------------------------------------------------------------------
def _matmul_t_affine_kernel(w_ref, a_ref, scale_ref, shift_ref, o_ref, *,
                            pre_relu, post_relu):
    """O^T = act((W^T @ act_pre(A^T)) * scale + shift).

    w_ref:     (N, K)  bf16   (N = Cout, un-padded; K = full reduction dim, one block)
    a_ref:     (K, tm) bf16   (tm = lane-dense M tile, multiple of 128)
    scale/shift: (N, 1) f32   (folded eval-mode BatchNorm)
    o_ref:     (N, tm) f32
    """
    a = a_ref[...]
    if pre_relu:
        a = jnp.maximum(a, 0)
    y = jnp.dot(w_ref[...], a, preferred_element_type=jnp.float32)
    y = y * scale_ref[...] + shift_ref[...]
    if post_relu:
        y = jnp.maximum(y, 0.0)
    o_ref[...] = y.astype(o_ref.dtype)


def _window_max_kernel(p_ref, o_ref):
    """p_ref: (9, tl) -> o_ref: (1, tl), max over the 9 pooling taps (sublane reduce)."""
    o_ref[...] = jnp.max(p_ref[...], axis=0, keepdims=True)


# ----------------------------------------------------------------------------
# Pallas wrappers
# ----------------------------------------------------------------------------
def matmul_t_affine(wt, at, scale, shift, pre_relu=False, post_relu=False):
    """wt: (N, K), at: (K, M), scale/shift: (N,) -> (N, M) f32.

    Single-axis grid over lane-dense M tiles; no Cout/K padding, bf16 MXU inputs.
    """
    N, K = wt.shape
    _, M = at.shape
    Mp = _rup(M, 128)
    tm = _pick_tile(Mp, 128, 512)

    at_p = jnp.pad(at.astype(jnp.bfloat16), ((0, 0), (0, Mp - M)))
    out = pl.pallas_call(
        functools.partial(_matmul_t_affine_kernel,
                          pre_relu=pre_relu, post_relu=post_relu),
        out_shape=jax.ShapeDtypeStruct((N, Mp), jnp.float32),
        grid_spec=pltpu.PrefetchScalarGridSpec(
            num_scalar_prefetch=0,
            grid=(Mp // tm,),
            in_specs=[
                pl.BlockSpec((N, K), lambda i: (0, 0)),    # weight: resident, index constant
                pl.BlockSpec((K, tm), lambda i: (0, i)),
                pl.BlockSpec((N, 1), lambda i: (0, 0)),    # folded BN scale
                pl.BlockSpec((N, 1), lambda i: (0, 0)),    # folded BN shift
            ],
            out_specs=pl.BlockSpec((N, tm), lambda i: (0, i)),
        ),
        compiler_params=pltpu.CompilerParams(dimension_semantics=("parallel",)),
    )(wt.astype(jnp.bfloat16), at_p,
      scale.reshape(-1, 1).astype(jnp.float32),
      shift.reshape(-1, 1).astype(jnp.float32))
    return out[:, :M]


def max_pool_3x3(x, stride):
    """MaxPool2d(kernel=3, stride, padding=1) on a channel-major (C, N, H, W) tensor."""
    C, Nb, H, W = x.shape
    Ho = (H + 2 - 3) // stride + 1
    Wo = (W + 2 - 3) // stride + 1
    xp = jnp.pad(x.astype(jnp.float32), ((0, 0), (0, 0), (1, 1), (1, 1)),
                 constant_values=-jnp.inf)
    taps = [xp[:, :, i:i + stride * Ho:stride, j:j + stride * Wo:stride]
            for i in range(3) for j in range(3)]
    L = C * Nb * Ho * Wo
    p = jnp.stack(taps, axis=0).reshape(9, L)            # reduce axis leading, lane-dense tail
    Lp = _rup(L, 128)
    tl = _pick_tile(Lp, 128, 16384)
    p = jnp.pad(p, ((0, 0), (0, Lp - L)), constant_values=-jnp.inf)

    out = pl.pallas_call(
        _window_max_kernel,
        out_shape=jax.ShapeDtypeStruct((1, Lp), jnp.float32),
        grid_spec=pltpu.PrefetchScalarGridSpec(
            num_scalar_prefetch=0,
            grid=(Lp // tl,),
            in_specs=[pl.BlockSpec((9, tl), lambda i: (0, i))],
            out_specs=pl.BlockSpec((1, tl), lambda i: (0, i)),
        ),
        compiler_params=pltpu.CompilerParams(dimension_semantics=("parallel",)),
    )(p)
    return out[0, :L].reshape(C, Nb, Ho, Wo)


# ----------------------------------------------------------------------------
# op wrappers (channel-major activations: (C, N, H, W))
# ----------------------------------------------------------------------------
def bn_fold(bn, eps=1e-5):
    scale = bn['gamma'] * jax.lax.rsqrt(bn['var'] + eps)
    shift = bn['beta'] - bn['mean'] * scale
    return scale, shift


def conv1x1_affine(x, wt, scale, shift, stride=1, pre_relu=False, post_relu=False):
    """1x1 conv fused with per-channel affine (BN) and optional pre/post ReLU."""
    C, N, H, W = x.shape
    if stride != 1:
        x = x[:, :, ::stride, ::stride]
        H, W = x.shape[2], x.shape[3]
    at = x.reshape(C, N * H * W)
    y = matmul_t_affine(wt, at, scale, shift, pre_relu=pre_relu, post_relu=post_relu)
    return y.reshape(-1, N, H, W)


def relu_conv_bn(p, x):
    """ReLUConvBN(Cin, Cout, 1, 1, 0): ReLU -> 1x1 Conv -> BN (eval), one fused matmul."""
    scale, shift = bn_fold(p['bn'])
    return conv1x1_affine(x, p['wt'], scale, shift, stride=1, pre_relu=True)


def factorized_reduce(p, x):
    """FactorizedReduce: ReLU -> two offset stride-2 1x1 convs -> concat -> BN.

    Fused into ONE matmul: channel-stack the two offset grids along K and use a
    block-diagonal (Cout, 2*Cin) weight (built at init), so the concatenated output
    falls out directly with the BN scale/shift aligned per channel.
    """
    C, N, H, W = x.shape
    scale, shift = bn_fold(p['bn'])
    a1 = x[:, :, ::2, ::2]
    a2 = x[:, :, 1::2, 1::2]
    Ho, Wo = a1.shape[2], a1.shape[3]
    at = jnp.concatenate([a1.reshape(C, -1), a2.reshape(C, -1)], axis=0)   # (2*Cin, M)
    y = matmul_t_affine(p['wt'], at, scale, shift, pre_relu=True)
    return y.reshape(-1, N, Ho, Wo)


def stem_forward(p, x_nchw):
    """Conv7x7(s=2,p=3,no bias) -> BN -> ReLU (one fused matmul) -> MaxPool3x3(s=2,p=1)."""
    N, Cin, H, W = x_nchw.shape
    scale, shift = bn_fold(p['bn'])
    # Patch feature dim is ordered (c_in major, 7x7 taps row-major minor) -> matches the
    # OIHW-flattened weight stored as (Cout, Cin*49).
    patches = jax.lax.conv_general_dilated_patches(
        x_nchw.astype(jnp.float32), filter_shape=(7, 7), window_strides=(2, 2),
        padding=((3, 3), (3, 3)), dimension_numbers=("NCHW", "OIHW", "NCHW"))
    _, K, Ho, Wo = patches.shape
    at = jnp.transpose(patches, (1, 0, 2, 3)).reshape(K, N * Ho * Wo)
    y = matmul_t_affine(p['w'], at, scale, shift, pre_relu=False, post_relu=True)
    y = y.reshape(-1, N, Ho, Wo)
    return max_pool_3x3(y, stride=2)


def apply_op(name, stride, p, x):
    if name == 'skip_connect':
        return x if stride == 1 else factorized_reduce(p, x)
    if name == 'max_pool_3x3':
        return max_pool_3x3(x, stride)
    raise ValueError(name)


def cell_forward(cp, s0, s1):
    s0 = factorized_reduce(cp['pre0'], s0) if cp['pre0_type'] == 'fr' else relu_conv_bn(cp['pre0'], s0)
    s1 = relu_conv_bn(cp['pre1'], s1)
    states = [s0, s1]
    for i in range(len(cp['ops']) // 2):
        name1, idx1, st1, p1 = cp['ops'][2 * i]
        name2, idx2, st2, p2 = cp['ops'][2 * i + 1]
        h1 = apply_op(name1, st1, p1, states[idx1])
        h2 = apply_op(name2, st2, p2, states[idx2])
        states.append(h1 + h2)                      # drop_path: no-op in eval mode
    return jnp.concatenate([states[i] for i in cp['concat']], axis=0)   # channel concat


# ----------------------------------------------------------------------------
# Deterministic parameter construction (mirrors NetworkEncoder.__init__, mode 2)
# Weights are stored pre-transposed / pre-fused in matmul-ready (Cout, K) form.
# ----------------------------------------------------------------------------
GENOTYPE = {
    'normal': [('skip_connect', 0), ('skip_connect', 1), ('max_pool_3x3', 0), ('skip_connect', 2)],
    'normal_concat': [2, 3],
    'reduce': [('skip_connect', 0), ('skip_connect', 1), ('max_pool_3x3', 0), ('skip_connect', 2)],
    'reduce_concat': [2, 3],
}


class KeyGen:
    def __init__(self, key):
        self.key = key

    def __call__(self):
        self.key, sub = jax.random.split(self.key)
        return sub


def init_bn(kg, C):
    return {
        'gamma': 1.0 + 0.1 * jax.random.normal(kg(), (C,), jnp.float32),
        'beta': 0.1 * jax.random.normal(kg(), (C,), jnp.float32),
        'mean': 0.1 * jax.random.normal(kg(), (C,), jnp.float32),
        'var': 1.0 + 0.1 * jnp.abs(jax.random.normal(kg(), (C,), jnp.float32)),
    }


def init_conv1x1_t(kg, cin, cout):
    return jax.random.normal(kg(), (cout, cin), jnp.float32) * (2.0 / cin) ** 0.5


def init_rcb(kg, cin, cout):
    return {'wt': init_conv1x1_t(kg, cin, cout), 'bn': init_bn(kg, cout)}


def init_fr(kg, cin, cout):
    assert cout % 2 == 0
    half = cout // 2
    w1t = init_conv1x1_t(kg, cin, half)
    w2t = init_conv1x1_t(kg, cin, half)
    z = jnp.zeros((half, cin), jnp.float32)
    wt = jnp.concatenate([jnp.concatenate([w1t, z], axis=1),
                          jnp.concatenate([z, w2t], axis=1)], axis=0)   # block-diagonal
    return {'wt': wt, 'bn': init_bn(kg, cout)}


def init_stem(kg, cin, cout):
    fan = cin * 49
    w = jax.random.normal(kg(), (cout, cin, 7, 7), jnp.float32) * (2.0 / fan) ** 0.5
    return {'w': w.reshape(cout, cin * 49), 'bn': init_bn(kg, cout)}


def build_cell(kg, genotype, Cpp, Cp, C, reduction, reduction_prev):
    cp = {}
    if reduction_prev:
        cp['pre0_type'], cp['pre0'] = 'fr', init_fr(kg, Cpp, C)
    else:
        cp['pre0_type'], cp['pre0'] = 'rcb', init_rcb(kg, Cpp, C)
    cp['pre1'] = init_rcb(kg, Cp, C)
    pairs = genotype['reduce'] if reduction else genotype['normal']
    concat = genotype['reduce_concat'] if reduction else genotype['normal_concat']
    ops = []
    for name, idx in pairs:
        stride = 2 if (reduction and idx < 2) else 1
        p = init_fr(kg, C, C) if (name == 'skip_connect' and stride == 2) else None
        ops.append((name, idx, stride, p))
    cp['ops'] = ops
    cp['concat'] = list(concat)
    cp['multiplier'] = len(concat)
    return cp


def build_branch_cells(kg, C, layers):
    cells = []
    Cpp, Cp, Cc = C, C, C
    red_prev = False
    for i in range(layers):
        if i in [layers // 3, 2 * layers // 3]:
            Cc *= 2
            red = True
        else:
            red = False
        cell = build_cell(kg, GENOTYPE, Cpp, Cp, Cc, red, red_prev)
        red_prev = red
        cells.append(cell)
        Cpp, Cp = Cp, cell['multiplier'] * Cc
    return cells, Cp


def build_network(kg, C_image=8, C_lidar=8, out_channels=32, layers_image=2, layers_lidar=2):
    params = {}
    params['stem_image'] = init_stem(kg, 3, C_image)
    params['cells_image'], Cp_i = build_branch_cells(kg, C_image, layers_image)
    params['image_fc'] = {'wt': 0.05 * jax.random.normal(kg(), (out_channels, Cp_i), jnp.float32),
                          'b': 0.05 * jax.random.normal(kg(), (out_channels,), jnp.float32)}
    params['stem_lidar'] = init_stem(kg, 1, C_lidar)
    params['cells_lidar'], Cp_l = build_branch_cells(kg, C_lidar, layers_lidar)
    params['lidar_fc'] = {'wt': 0.05 * jax.random.normal(kg(), (out_channels, Cp_l), jnp.float32),
                          'b': 0.05 * jax.random.normal(kg(), (out_channels,), jnp.float32)}
    return params


# ----------------------------------------------------------------------------
# NetworkEncoder.forward (search_mode == 2)
# ----------------------------------------------------------------------------
def network_encoder_forward(params, image_list, lidar_list):
    # image_list: (bz, 3, H, W) NCHW; lidar_list: (1, bz, 1, H, W)
    lidar_list = lidar_list[0]                           # .squeeze(0)

    def branch(x_nchw, stem_p, cells, fc):
        s = stem_forward(stem_p, x_nchw)                 # (C, bz, H/4, W/4), channel-major
        s0 = s1 = s
        for cp in cells:
            s0, s1 = s1, cell_forward(cp, s0, s1)        # drop_prob = 0 (eval mode)
        # Per perf review: global-avg-pool and the (bz x Cp) FC are trivially small;
        # plain jnp avoids two Pallas dispatches that would be mostly padding.
        feat = jnp.mean(s1, axis=(2, 3))                 # (Cp, bz)
        return jnp.dot(fc['wt'], feat) + fc['b'][:, None]   # (out_channels, bz)

    image_t = branch(image_list.astype(jnp.float32),
                     params['stem_image'], params['cells_image'], params['image_fc'])
    lidar_t = branch(lidar_list.astype(jnp.float32),
                     params['stem_lidar'], params['cells_lidar'], params['lidar_fc'])

    # torch: cat([img,(bz,1,out)],[lid]) dim1 -> sum dim1 -> permute(1,0) -> unsqueeze(0).
    # Channel-major branch outputs are already (out, bz), so this is just an add.
    fused = image_t + lidar_t
    return fused[None]                                   # (1, out_channels, bz)


# ----------------------------------------------------------------------------
if __name__ == "__main__":
    key = jax.random.PRNGKey(0)
    k_params, k_img, k_lid = jax.random.split(key, 3)

    BZ, H, W = 2, 32, 32
    OUT_CH = 32
    params = build_network(KeyGen(k_params), C_image=8, C_lidar=8,
                           out_channels=OUT_CH, layers_image=2, layers_lidar=2)

    image_list = jax.random.normal(k_img, (BZ, 3, H, W), jnp.float32)
    lidar_list = jax.random.normal(k_lid, (1, BZ, 1, H, W), jnp.float32)

    fwd = jax.jit(lambda a, b: network_encoder_forward(params, a, b))
    out = jax.block_until_ready(fwd(image_list, lidar_list))

    assert out.shape == (1, OUT_CH, BZ), out.shape
    assert bool(jnp.all(jnp.isfinite(out)))
    print("KERNEL_OK")
</pallas_src>

<mosaic_0001>
module attributes {stable_mosaic.version = 11 : i64} {
  func.func @_matmul_t_affine_kernel(%arg0: i32, %arg1: memref<8x147xbf16, #tpu.memory_space<vmem>>, %arg2: memref<147x512xbf16, #tpu.memory_space<vmem>>, %arg3: memref<8x1xf32, #tpu.memory_space<vmem>>, %arg4: memref<8x1xf32, #tpu.memory_space<vmem>>, %arg5: memref<8x512xf32, #tpu.memory_space<vmem>>) attributes {dimension_semantics = [#tpu.dimension_semantics<parallel>], iteration_bounds = array<i64: 1>, scalar_prefetch = 0 : i64, scratch_operands = 0 : i64, tpu.core_type = #tpu.core_type<tc>, window_params = [{pipeline_mode = #tpu.pipeline_mode<synchronous>, transform_indices = @transform_0, window_bounds = array<i64: 8, 147>}, {transform_indices = @transform_1, window_bounds = array<i64: 147, 512>}, {pipeline_mode = #tpu.pipeline_mode<synchronous>, transform_indices = @transform_2, window_bounds = array<i64: 8, 1>}, {pipeline_mode = #tpu.pipeline_mode<synchronous>, transform_indices = @transform_3, window_bounds = array<i64: 8, 1>}, {transform_indices = @transform_4, window_bounds = array<i64: 8, 512>}]} {
    %c0 = arith.constant 0 : index
    %c0_0 = arith.constant 0 : index
    %0 = vector.load %arg2[%c0, %c0_0] : memref<147x512xbf16, #tpu.memory_space<vmem>>, vector<147x512xbf16>
    %c0_1 = arith.constant 0 : index
    %c0_2 = arith.constant 0 : index
    %1 = vector.load %arg1[%c0_1, %c0_2] : memref<8x147xbf16, #tpu.memory_space<vmem>>, vector<8x147xbf16>
    %cst = arith.constant dense<0.000000e+00> : vector<8x512xf32>
    %2 = tpu.matmul %1, %0, %cst {dimension_numbers = #tpu.dot_dimension_numbers<[1], [0], [0], [1], [0, 0, 1, 1], [], []>} : vector<8x147xbf16>, vector<147x512xbf16>, vector<8x512xf32> -> vector<8x512xf32>
    %c0_3 = arith.constant 0 : index
    %c0_4 = arith.constant 0 : index
    %3 = vector.load %arg3[%c0_3, %c0_4] : memref<8x1xf32, #tpu.memory_space<vmem>>, vector<8x1xf32>
    %4 = vector.broadcast %3 : vector<8x1xf32> to vector<8x512xf32>
    %5 = arith.mulf %2, %4 : vector<8x512xf32>
    %c0_5 = arith.constant 0 : index
    %c0_6 = arith.constant 0 : index
    %6 = vector.load %arg4[%c0_5, %c0_6] : memref<8x1xf32, #tpu.memory_space<vmem>>, vector<8x1xf32>
    %7 = vector.broadcast %6 : vector<8x1xf32> to vector<8x512xf32>
    %8 = arith.addf %5, %7 : vector<8x512xf32>
    %cst_7 = arith.constant 0.000000e+00 : f32
    %9 = vector.broadcast %cst_7 : f32 to vector<8x512xf32>
    %10 = arith.maximumf %8, %9 : vector<8x512xf32>
    %c0_8 = arith.constant 0 : index
    %c0_9 = arith.constant 0 : index
    %11 = vector.load %arg5[%c0_8, %c0_9] : memref<8x512xf32, #tpu.memory_space<vmem>>, vector<8x512xf32>
    tpu.vector_store %arg5[%c0_8, %c0_9], %10 {strides = array<i32>} : memref<8x512xf32, #tpu.memory_space<vmem>>, vector<8x512xf32>,
    return
  }
  func.func @transform_0(%arg0: i32) -> (i32, i32) {
    %c0_i32 = arith.constant 0 : i32
    %c0_i32_0 = arith.constant 0 : i32
    %c0_i32_1 = arith.constant 0 : i32
    return %c0_i32, %c0_i32_0 : i32, i32
  }
  func.func @transform_1(%arg0: i32) -> (i32, i32) {
    %c0_i32 = arith.constant 0 : i32
    %c0_i32_0 = arith.constant 0 : i32
    return %c0_i32, %arg0 : i32, i32
  }
  func.func @transform_2(%arg0: i32) -> (i32, i32) {
    %c0_i32 = arith.constant 0 : i32
    %c0_i32_0 = arith.constant 0 : i32
    %c0_i32_1 = arith.constant 0 : i32
    return %c0_i32, %c0_i32_0 : i32, i32
  }
  func.func @transform_3(%arg0: i32) -> (i32, i32) {
    %c0_i32 = arith.constant 0 : i32
    %c0_i32_0 = arith.constant 0 : i32
    %c0_i32_1 = arith.constant 0 : i32
    return %c0_i32, %c0_i32_0 : i32, i32
  }
  func.func @transform_4(%arg0: i32) -> (i32, i32) {
    %c0_i32 = arith.constant 0 : i32
    %c0_i32_0 = arith.constant 0 : i32
    return %c0_i32, %arg0 : i32, i32
  }
}

module attributes {stable_mosaic.version = 11 : i64} {
  func.func @_window_max_kernel(%arg0: i32, %arg1: memref<9x1024xf32, #tpu.memory_space<vmem>>, %arg2: memref<1x1024xf32, #tpu.memory_space<vmem>>) attributes {dimension_semantics = [#tpu.dimension_semantics<parallel>], iteration_bounds = array<i64: 1>, scalar_prefetch = 0 : i64, scratch_operands = 0 : i64, tpu.core_type = #tpu.core_type<tc>, window_params = [{transform_indices = @transform_0, window_bounds = array<i64: 9, 1024>}, {transform_indices = @transform_1, window_bounds = array<i64: 1, 1024>}]} {
    %c0 = arith.constant 0 : index
    %c0_0 = arith.constant 0 : index
    %0 = vector.load %arg1[%c0, %c0_0] : memref<9x1024xf32, #tpu.memory_space<vmem>>, vector<9x1024xf32>
    %cst = arith.constant dense<0xFF800000> : vector<1024xf32>
    %1 = vector.multi_reduction <maximumf>, %0, %cst [0] : vector<9x1024xf32> to vector<1024xf32>
    %2 = vector.shape_cast %1 : vector<1024xf32> to vector<1x1024xf32>
    %c0_1 = arith.constant 0 : index
    %c0_2 = arith.constant 0 : index
    %3 = vector.load %arg2[%c0_1, %c0_2] : memref<1x1024xf32, #tpu.memory_space<vmem>>, vector<1x1024xf32>
    tpu.vector_store %arg2[%c0_1, %c0_2], %2 {strides = array<i32>} : memref<1x1024xf32, #tpu.memory_space<vmem>>, vector<1x1024xf32>,
    return
  }
  func.func @transform_0(%arg0: i32) -> (i32, i32) {
    %c0_i32 = arith.constant 0 : i32
    %c0_i32_0 = arith.constant 0 : i32
    return %c0_i32, %arg0 : i32, i32
  }
  func.func @transform_1(%arg0: i32) -> (i32, i32) {
    %c0_i32 = arith.constant 0 : i32
    %c0_i32_0 = arith.constant 0 : i32
    return %c0_i32, %arg0 : i32, i32
  }
}

module attributes {stable_mosaic.version = 11 : i64} {
  func.func @_matmul_t_affine_kernel(%arg0: i32, %arg1: memref<16x8xbf16, #tpu.memory_space<vmem>>, %arg2: memref<8x128xbf16, #tpu.memory_space<vmem>>, %arg3: memref<16x1xf32, #tpu.memory_space<vmem>>, %arg4: memref<16x1xf32, #tpu.memory_space<vmem>>, %arg5: memref<16x128xf32, #tpu.memory_space<vmem>>) attributes {dimension_semantics = [#tpu.dimension_semantics<parallel>], iteration_bounds = array<i64: 1>, scalar_prefetch = 0 : i64, scratch_operands = 0 : i64, tpu.core_type = #tpu.core_type<tc>, window_params = [{pipeline_mode = #tpu.pipeline_mode<synchronous>, transform_indices = @transform_0, window_bounds = array<i64: 16, 8>}, {transform_indices = @transform_1, window_bounds = array<i64: 8, 128>}, {pipeline_mode = #tpu.pipeline_mode<synchronous>, transform_indices = @transform_2, window_bounds = array<i64: 16, 1>}, {pipeline_mode = #tpu.pipeline_mode<synchronous>, transform_indices = @transform_3, window_bounds = array<i64: 16, 1>}, {transform_indices = @transform_4, window_bounds = array<i64: 16, 128>}]} {
    %c0 = arith.constant 0 : index
    %c0_0 = arith.constant 0 : index
    %0 = vector.load %arg2[%c0, %c0_0] : memref<8x128xbf16, #tpu.memory_space<vmem>>, vector<8x128xbf16>
    %cst = arith.constant 0.000000e+00 : bf16
    %1 = vector.broadcast %cst : bf16 to vector<8x128xbf16>
    %2 = arith.maximumf %0, %1 : vector<8x128xbf16>
    %c0_1 = arith.constant 0 : index
    %c0_2 = arith.constant 0 : index
    %3 = vector.load %arg1[%c0_1, %c0_2] : memref<16x8xbf16, #tpu.memory_space<vmem>>, vector<16x8xbf16>
    %cst_3 = arith.constant dense<0.000000e+00> : vector<16x128xf32>
    %4 = tpu.matmul %3, %2, %cst_3 {dimension_numbers = #tpu.dot_dimension_numbers<[1], [0], [0], [1], [0, 0, 1, 1], [], []>} : vector<16x8xbf16>, vector<8x128xbf16>, vector<16x128xf32> -> vector<16x128xf32>
    %c0_4 = arith.constant 0 : index
    %c0_5 = arith.constant 0 : index
    %5 = vector.load %arg3[%c0_4, %c0_5] : memref<16x1xf32, #tpu.memory_space<vmem>>, vector<16x1xf32>
    %6 = vector.broadcast %5 : vector<16x1xf32> to vector<16x128xf32>
    %7 = arith.mulf %4, %6 : vector<16x128xf32>
    %c0_6 = arith.constant 0 : index
    %c0_7 = arith.constant 0 : index
    %8 = vector.load %arg4[%c0_6, %c0_7] : memref<16x1xf32, #tpu.memory_space<vmem>>, vector<16x1xf32>
    %9 = vector.broadcast %8 : vector<16x1xf32> to vector<16x128xf32>
    %10 = arith.addf %7, %9 : vector<16x128xf32>
    %c0_8 = arith.constant 0 : index
    %c0_9 = arith.constant 0 : index
    %11 = vector.load %arg5[%c0_8, %c0_9] : memref<16x128xf32, #tpu.memory_space<vmem>>, vector<16x128xf32>
    tpu.vector_store %arg5[%c0_8, %c0_9], %10 {strides = array<i32>} : memref<16x128xf32, #tpu.memory_space<vmem>>, vector<16x128xf32>,
    return
  }
  func.func @transform_0(%arg0: i32) -> (i32, i32) {
    %c0_i32 = arith.constant 0 : i32
    %c0_i32_0 = arith.constant 0 : i32
    %c0_i32_1 = arith.constant 0 : i32
    return %c0_i32, %c0_i32_0 : i32, i32
  }
  func.func @transform_1(%arg0: i32) -> (i32, i32) {
    %c0_i32 = arith.constant 0 : i32
    %c0_i32_0 = arith.constant 0 : i32
    return %c0_i32, %arg0 : i32, i32
  }
  func.func @transform_2(%arg0: i32) -> (i32, i32) {
    %c0_i32 = arith.constant 0 : i32
    %c0_i32_0 = arith.constant 0 : i32
    %c0_i32_1 = arith.constant 0 : i32
    return %c0_i32, %c0_i32_0 : i32, i32
  }
  func.func @transform_3(%arg0: i32) -> (i32, i32) {
    %c0_i32 = arith.constant 0 : i32
    %c0_i32_0 = arith.constant 0 : i32
    %c0_i32_1 = arith.constant 0 : i32
    return %c0_i32, %c0_i32_0 : i32, i32
  }
  func.func @transform_4(%arg0: i32) -> (i32, i32) {
    %c0_i32 = arith.constant 0 : i32
    %c0_i32_0 = arith.constant 0 : i32
    return %c0_i32, %arg0 : i32, i32
  }
}

module attributes {stable_mosaic.version = 11 : i64} {
  func.func @_window_max_kernel(%arg0: i32, %arg1: memref<9x512xf32, #tpu.memory_space<vmem>>, %arg2: memref<1x512xf32, #tpu.memory_space<vmem>>) attributes {dimension_semantics = [#tpu.dimension_semantics<parallel>], iteration_bounds = array<i64: 1>, scalar_prefetch = 0 : i64, scratch_operands = 0 : i64, tpu.core_type = #tpu.core_type<tc>, window_params = [{transform_indices = @transform_0, window_bounds = array<i64: 9, 512>}, {transform_indices = @transform_1, window_bounds = array<i64: 1, 512>}]} {
    %c0 = arith.constant 0 : index
    %c0_0 = arith.constant 0 : index
    %0 = vector.load %arg1[%c0, %c0_0] : memref<9x512xf32, #tpu.memory_space<vmem>>, vector<9x512xf32>
    %cst = arith.constant dense<0xFF800000> : vector<512xf32>
    %1 = vector.multi_reduction <maximumf>, %0, %cst [0] : vector<9x512xf32> to vector<512xf32>
    %2 = vector.shape_cast %1 : vector<512xf32> to vector<1x512xf32>
    %c0_1 = arith.constant 0 : index
    %c0_2 = arith.constant 0 : index
    %3 = vector.load %arg2[%c0_1, %c0_2] : memref<1x512xf32, #tpu.memory_space<vmem>>, vector<1x512xf32>
    tpu.vector_store %arg2[%c0_1, %c0_2], %2 {strides = array<i32>} : memref<1x512xf32, #tpu.memory_space<vmem>>, vector<1x512xf32>,
    return
  }
  func.func @transform_0(%arg0: i32) -> (i32, i32) {
    %c0_i32 = arith.constant 0 : i32
    %c0_i32_0 = arith.constant 0 : i32
    return %c0_i32, %arg0 : i32, i32
  }
  func.func @transform_1(%arg0: i32) -> (i32, i32) {
    %c0_i32 = arith.constant 0 : i32
    %c0_i32_0 = arith.constant 0 : i32
    return %c0_i32, %arg0 : i32, i32
  }
}

module attributes {stable_mosaic.version = 11 : i64} {
  func.func @_matmul_t_affine_kernel(%arg0: i32, %arg1: memref<16x32xbf16, #tpu.memory_space<vmem>>, %arg2: memref<32x128xbf16, #tpu.memory_space<vmem>>, %arg3: memref<16x1xf32, #tpu.memory_space<vmem>>, %arg4: memref<16x1xf32, #tpu.memory_space<vmem>>, %arg5: memref<16x128xf32, #tpu.memory_space<vmem>>) attributes {dimension_semantics = [#tpu.dimension_semantics<parallel>], iteration_bounds = array<i64: 1>, scalar_prefetch = 0 : i64, scratch_operands = 0 : i64, tpu.core_type = #tpu.core_type<tc>, window_params = [{pipeline_mode = #tpu.pipeline_mode<synchronous>, transform_indices = @transform_0, window_bounds = array<i64: 16, 32>}, {transform_indices = @transform_1, window_bounds = array<i64: 32, 128>}, {pipeline_mode = #tpu.pipeline_mode<synchronous>, transform_indices = @transform_2, window_bounds = array<i64: 16, 1>}, {pipeline_mode = #tpu.pipeline_mode<synchronous>, transform_indices = @transform_3, window_bounds = array<i64: 16, 1>}, {transform_indices = @transform_4, window_bounds = array<i64: 16, 128>}]} {
    %c0 = arith.constant 0 : index
    %c0_0 = arith.constant 0 : index
    %0 = vector.load %arg2[%c0, %c0_0] : memref<32x128xbf16, #tpu.memory_space<vmem>>, vector<32x128xbf16>
    %cst = arith.constant 0.000000e+00 : bf16
    %1 = vector.broadcast %cst : bf16 to vector<32x128xbf16>
    %2 = arith.maximumf %0, %1 : vector<32x128xbf16>
    %c0_1 = arith.constant 0 : index
    %c0_2 = arith.constant 0 : index
    %3 = vector.load %arg1[%c0_1, %c0_2] : memref<16x32xbf16, #tpu.memory_space<vmem>>, vector<16x32xbf16>
    %cst_3 = arith.constant dense<0.000000e+00> : vector<16x128xf32>
    %4 = tpu.matmul %3, %2, %cst_3 {dimension_numbers = #tpu.dot_dimension_numbers<[1], [0], [0], [1], [0, 0, 1, 1], [], []>} : vector<16x32xbf16>, vector<32x128xbf16>, vector<16x128xf32> -> vector<16x128xf32>
    %c0_4 = arith.constant 0 : index
    %c0_5 = arith.constant 0 : index
    %5 = vector.load %arg3[%c0_4, %c0_5] : memref<16x1xf32, #tpu.memory_space<vmem>>, vector<16x1xf32>
    %6 = vector.broadcast %5 : vector<16x1xf32> to vector<16x128xf32>
    %7 = arith.mulf %4, %6 : vector<16x128xf32>
    %c0_6 = arith.constant 0 : index
    %c0_7 = arith.constant 0 : index
    %8 = vector.load %arg4[%c0_6, %c0_7] : memref<16x1xf32, #tpu.memory_space<vmem>>, vector<16x1xf32>
    %9 = vector.broadcast %8 : vector<16x1xf32> to vector<16x128xf32>
    %10 = arith.addf %7, %9 : vector<16x128xf32>
    %c0_8 = arith.constant 0 : index
    %c0_9 = arith.constant 0 : index
    %11 = vector.load %arg5[%c0_8, %c0_9] : memref<16x128xf32, #tpu.memory_space<vmem>>, vector<16x128xf32>
    tpu.vector_store %arg5[%c0_8, %c0_9], %10 {strides = array<i32>} : memref<16x128xf32, #tpu.memory_space<vmem>>, vector<16x128xf32>,
    return
  }
  func.func @transform_0(%arg0: i32) -> (i32, i32) {
    %c0_i32 = arith.constant 0 : i32
    %c0_i32_0 = arith.constant 0 : i32
    %c0_i32_1 = arith.constant 0 : i32
    return %c0_i32, %c0_i32_0 : i32, i32
  }
  func.func @transform_1(%arg0: i32) -> (i32, i32) {
    %c0_i32 = arith.constant 0 : i32
    %c0_i32_0 = arith.constant 0 : i32
    return %c0_i32, %arg0 : i32, i32
  }
  func.func @transform_2(%arg0: i32) -> (i32, i32) {
    %c0_i32 = arith.constant 0 : i32
    %c0_i32_0 = arith.constant 0 : i32
    %c0_i32_1 = arith.constant 0 : i32
    return %c0_i32, %c0_i32_0 : i32, i32
  }
  func.func @transform_3(%arg0: i32) -> (i32, i32) {
    %c0_i32 = arith.constant 0 : i32
    %c0_i32_0 = arith.constant 0 : i32
    %c0_i32_1 = arith.constant 0 : i32
    return %c0_i32, %c0_i32_0 : i32, i32
  }
  func.func @transform_4(%arg0: i32) -> (i32, i32) {
    %c0_i32 = arith.constant 0 : i32
    %c0_i32_0 = arith.constant 0 : i32
    return %c0_i32, %arg0 : i32, i32
  }
}

module attributes {stable_mosaic.version = 11 : i64} {
  func.func @_matmul_t_affine_kernel(%arg0: i32, %arg1: memref<32x32xbf16, #tpu.memory_space<vmem>>, %arg2: memref<32x128xbf16, #tpu.memory_space<vmem>>, %arg3: memref<32x1xf32, #tpu.memory_space<vmem>>, %arg4: memref<32x1xf32, #tpu.memory_space<vmem>>, %arg5: memref<32x128xf32, #tpu.memory_space<vmem>>) attributes {dimension_semantics = [#tpu.dimension_semantics<parallel>], iteration_bounds = array<i64: 1>, scalar_prefetch = 0 : i64, scratch_operands = 0 : i64, tpu.core_type = #tpu.core_type<tc>, window_params = [{pipeline_mode = #tpu.pipeline_mode<synchronous>, transform_indices = @transform_0, window_bounds = array<i64: 32, 32>}, {transform_indices = @transform_1, window_bounds = array<i64: 32, 128>}, {pipeline_mode = #tpu.pipeline_mode<synchronous>, transform_indices = @transform_2, window_bounds = array<i64: 32, 1>}, {pipeline_mode = #tpu.pipeline_mode<synchronous>, transform_indices = @transform_3, window_bounds = array<i64: 32, 1>}, {transform_indices = @transform_4, window_bounds = array<i64: 32, 128>}]} {
    %c0 = arith.constant 0 : index
    %c0_0 = arith.constant 0 : index
    %0 = vector.load %arg2[%c0, %c0_0] : memref<32x128xbf16, #tpu.memory_space<vmem>>, vector<32x128xbf16>
    %cst = arith.constant 0.000000e+00 : bf16
    %1 = vector.broadcast %cst : bf16 to vector<32x128xbf16>
    %2 = arith.maximumf %0, %1 : vector<32x128xbf16>
    %c0_1 = arith.constant 0 : index
    %c0_2 = arith.constant 0 : index
    %3 = vector.load %arg1[%c0_1, %c0_2] : memref<32x32xbf16, #tpu.memory_space<vmem>>, vector<32x32xbf16>
    %cst_3 = arith.constant dense<0.000000e+00> : vector<32x128xf32>
    %4 = tpu.matmul %3, %2, %cst_3 {dimension_numbers = #tpu.dot_dimension_numbers<[1], [0], [0], [1], [0, 0, 1, 1], [], []>} : vector<32x32xbf16>, vector<32x128xbf16>, vector<32x128xf32> -> vector<32x128xf32>
    %c0_4 = arith.constant 0 : index
    %c0_5 = arith.constant 0 : index
    %5 = vector.load %arg3[%c0_4, %c0_5] : memref<32x1xf32, #tpu.memory_space<vmem>>, vector<32x1xf32>
    %6 = vector.broadcast %5 : vector<32x1xf32> to vector<32x128xf32>
    %7 = arith.mulf %4, %6 : vector<32x128xf32>
    %c0_6 = arith.constant 0 : index
    %c0_7 = arith.constant 0 : index
    %8 = vector.load %arg4[%c0_6, %c0_7] : memref<32x1xf32, #tpu.memory_space<vmem>>, vector<32x1xf32>
    %9 = vector.broadcast %8 : vector<32x1xf32> to vector<32x128xf32>
    %10 = arith.addf %7, %9 : vector<32x128xf32>
    %c0_8 = arith.constant 0 : index
    %c0_9 = arith.constant 0 : index
    %11 = vector.load %arg5[%c0_8, %c0_9] : memref<32x128xf32, #tpu.memory_space<vmem>>, vector<32x128xf32>
    tpu.vector_store %arg5[%c0_8, %c0_9], %10 {strides = array<i32>} : memref<32x128xf32, #tpu.memory_space<vmem>>, vector<32x128xf32>,
    return
  }
  func.func @transform_0(%arg0: i32) -> (i32, i32) {
    %c0_i32 = arith.constant 0 : i32
    %c0_i32_0 = arith.constant 0 : i32
    %c0_i32_1 = arith.constant 0 : i32
    return %c0_i32, %c0_i32_0 : i32, i32
  }
  func.func @transform_1(%arg0: i32) -> (i32, i32) {
    %c0_i32 = arith.constant 0 : i32
    %c0_i32_0 = arith.constant 0 : i32
    return %c0_i32, %arg0 : i32, i32
  }
  func.func @transform_2(%arg0: i32) -> (i32, i32) {
    %c0_i32 = arith.constant 0 : i32
    %c0_i32_0 = arith.constant 0 : i32
    %c0_i32_1 = arith.constant 0 : i32
    return %c0_i32, %c0_i32_0 : i32, i32
  }
  func.func @transform_3(%arg0: i32) -> (i32, i32) {
    %c0_i32 = arith.constant 0 : i32
    %c0_i32_0 = arith.constant 0 : i32
    %c0_i32_1 = arith.constant 0 : i32
    return %c0_i32, %c0_i32_0 : i32, i32
  }
  func.func @transform_4(%arg0: i32) -> (i32, i32) {
    %c0_i32 = arith.constant 0 : i32
    %c0_i32_0 = arith.constant 0 : i32
    return %c0_i32, %arg0 : i32, i32
  }
}

module attributes {stable_mosaic.version = 11 : i64} {
  func.func @_matmul_t_affine_kernel(%arg0: i32, %arg1: memref<32x64xbf16, #tpu.memory_space<vmem>>, %arg2: memref<64x128xbf16, #tpu.memory_space<vmem>>, %arg3: memref<32x1xf32, #tpu.memory_space<vmem>>, %arg4: memref<32x1xf32, #tpu.memory_space<vmem>>, %arg5: memref<32x128xf32, #tpu.memory_space<vmem>>) attributes {dimension_semantics = [#tpu.dimension_semantics<parallel>], iteration_bounds = array<i64: 1>, scalar_prefetch = 0 : i64, scratch_operands = 0 : i64, tpu.core_type = #tpu.core_type<tc>, window_params = [{pipeline_mode = #tpu.pipeline_mode<synchronous>, transform_indices = @transform_0, window_bounds = array<i64: 32, 64>}, {transform_indices = @transform_1, window_bounds = array<i64: 64, 128>}, {pipeline_mode = #tpu.pipeline_mode<synchronous>, transform_indices = @transform_2, window_bounds = array<i64: 32, 1>}, {pipeline_mode = #tpu.pipeline_mode<synchronous>, transform_indices = @transform_3, window_bounds = array<i64: 32, 1>}, {transform_indices = @transform_4, window_bounds = array<i64: 32, 128>}]} {
    %c0 = arith.constant 0 : index
    %c0_0 = arith.constant 0 : index
    %0 = vector.load %arg2[%c0, %c0_0] : memref<64x128xbf16, #tpu.memory_space<vmem>>, vector<64x128xbf16>
    %cst = arith.constant 0.000000e+00 : bf16
    %1 = vector.broadcast %cst : bf16 to vector<64x128xbf16>
    %2 = arith.maximumf %0, %1 : vector<64x128xbf16>
    %c0_1 = arith.constant 0 : index
    %c0_2 = arith.constant 0 : index
    %3 = vector.load %arg1[%c0_1, %c0_2] : memref<32x64xbf16, #tpu.memory_space<vmem>>, vector<32x64xbf16>
    %cst_3 = arith.constant dense<0.000000e+00> : vector<32x128xf32>
    %4 = tpu.matmul %3, %2, %cst_3 {dimension_numbers = #tpu.dot_dimension_numbers<[1], [0], [0], [1], [0, 0, 1, 1], [], []>} : vector<32x64xbf16>, vector<64x128xbf16>, vector<32x128xf32> -> vector<32x128xf32>
    %c0_4 = arith.constant 0 : index
    %c0_5 = arith.constant 0 : index
    %5 = vector.load %arg3[%c0_4, %c0_5] : memref<32x1xf32, #tpu.memory_space<vmem>>, vector<32x1xf32>
    %6 = vector.broadcast %5 : vector<32x1xf32> to vector<32x128xf32>
    %7 = arith.mulf %4, %6 : vector<32x128xf32>
    %c0_6 = arith.constant 0 : index
    %c0_7 = arith.constant 0 : index
    %8 = vector.load %arg4[%c0_6, %c0_7] : memref<32x1xf32, #tpu.memory_space<vmem>>, vector<32x1xf32>
    %9 = vector.broadcast %8 : vector<32x1xf32> to vector<32x128xf32>
    %10 = arith.addf %7, %9 : vector<32x128xf32>
    %c0_8 = arith.constant 0 : index
    %c0_9 = arith.constant 0 : index
    %11 = vector.load %arg5[%c0_8, %c0_9] : memref<32x128xf32, #tpu.memory_space<vmem>>, vector<32x128xf32>
    tpu.vector_store %arg5[%c0_8, %c0_9], %10 {strides = array<i32>} : memref<32x128xf32, #tpu.memory_space<vmem>>, vector<32x128xf32>,
    return
  }
  func.func @transform_0(%arg0: i32) -> (i32, i32) {
    %c0_i32 = arith.constant 0 : i32
    %c0_i32_0 = arith.constant 0 : i32
    %c0_i32_1 = arith.constant 0 : i32
    return %c0_i32, %c0_i32_0 : i32, i32
  }
  func.func @transform_1(%arg0: i32) -> (i32, i32) {
    %c0_i32 = arith.constant 0 : i32
    %c0_i32_0 = arith.constant 0 : i32
    return %c0_i32, %arg0 : i32, i32
  }
  func.func @transform_2(%arg0: i32) -> (i32, i32) {
    %c0_i32 = arith.constant 0 : i32
    %c0_i32_0 = arith.constant 0 : i32
    %c0_i32_1 = arith.constant 0 : i32
    return %c0_i32, %c0_i32_0 : i32, i32
  }
  func.func @transform_3(%arg0: i32) -> (i32, i32) {
    %c0_i32 = arith.constant 0 : i32
    %c0_i32_0 = arith.constant 0 : i32
    %c0_i32_1 = arith.constant 0 : i32
    return %c0_i32, %c0_i32_0 : i32, i32
  }
  func.func @transform_4(%arg0: i32) -> (i32, i32) {
    %c0_i32 = arith.constant 0 : i32
    %c0_i32_0 = arith.constant 0 : i32
    return %c0_i32, %arg0 : i32, i32
  }
}

module attributes {stable_mosaic.version = 11 : i64} {
  func.func @_matmul_t_affine_kernel(%arg0: i32, %arg1: memref<32x16xbf16, #tpu.memory_space<vmem>>, %arg2: memref<16x128xbf16, #tpu.memory_space<vmem>>, %arg3: memref<32x1xf32, #tpu.memory_space<vmem>>, %arg4: memref<32x1xf32, #tpu.memory_space<vmem>>, %arg5: memref<32x128xf32, #tpu.memory_space<vmem>>) attributes {dimension_semantics = [#tpu.dimension_semantics<parallel>], iteration_bounds = array<i64: 1>, scalar_prefetch = 0 : i64, scratch_operands = 0 : i64, tpu.core_type = #tpu.core_type<tc>, window_params = [{pipeline_mode = #tpu.pipeline_mode<synchronous>, transform_indices = @transform_0, window_bounds = array<i64: 32, 16>}, {transform_indices = @transform_1, window_bounds = array<i64: 16, 128>}, {pipeline_mode = #tpu.pipeline_mode<synchronous>, transform_indices = @transform_2, window_bounds = array<i64: 32, 1>}, {pipeline_mode = #tpu.pipeline_mode<synchronous>, transform_indices = @transform_3, window_bounds = array<i64: 32, 1>}, {transform_indices = @transform_4, window_bounds = array<i64: 32, 128>}]} {
    %c0 = arith.constant 0 : index
    %c0_0 = arith.constant 0 : index
    %0 = vector.load %arg2[%c0, %c0_0] : memref<16x128xbf16, #tpu.memory_space<vmem>>, vector<16x128xbf16>
    %cst = arith.constant 0.000000e+00 : bf16
    %1 = vector.broadcast %cst : bf16 to vector<16x128xbf16>
    %2 = arith.maximumf %0, %1 : vector<16x128xbf16>
    %c0_1 = arith.constant 0 : index
    %c0_2 = arith.constant 0 : index
    %3 = vector.load %arg1[%c0_1, %c0_2] : memref<32x16xbf16, #tpu.memory_space<vmem>>, vector<32x16xbf16>
    %cst_3 = arith.constant dense<0.000000e+00> : vector<32x128xf32>
    %4 = tpu.matmul %3, %2, %cst_3 {dimension_numbers = #tpu.dot_dimension_numbers<[1], [0], [0], [1], [0, 0, 1, 1], [], []>} : vector<32x16xbf16>, vector<16x128xbf16>, vector<32x128xf32> -> vector<32x128xf32>
    %c0_4 = arith.constant 0 : index
    %c0_5 = arith.constant 0 : index
    %5 = vector.load %arg3[%c0_4, %c0_5] : memref<32x1xf32, #tpu.memory_space<vmem>>, vector<32x1xf32>
    %6 = vector.broadcast %5 : vector<32x1xf32> to vector<32x128xf32>
    %7 = arith.mulf %4, %6 : vector<32x128xf32>
    %c0_6 = arith.constant 0 : index
    %c0_7 = arith.constant 0 : index
    %8 = vector.load %arg4[%c0_6, %c0_7] : memref<32x1xf32, #tpu.memory_space<vmem>>, vector<32x1xf32>
    %9 = vector.broadcast %8 : vector<32x1xf32> to vector<32x128xf32>
    %10 = arith.addf %7, %9 : vector<32x128xf32>
    %c0_8 = arith.constant 0 : index
    %c0_9 = arith.constant 0 : index
    %11 = vector.load %arg5[%c0_8, %c0_9] : memref<32x128xf32, #tpu.memory_space<vmem>>, vector<32x128xf32>
    tpu.vector_store %arg5[%c0_8, %c0_9], %10 {strides = array<i32>} : memref<32x128xf32, #tpu.memory_space<vmem>>, vector<32x128xf32>,
    return
  }
  func.func @transform_0(%arg0: i32) -> (i32, i32) {
    %c0_i32 = arith.constant 0 : i32
    %c0_i32_0 = arith.constant 0 : i32
    %c0_i32_1 = arith.constant 0 : i32
    return %c0_i32, %c0_i32_0 : i32, i32
  }
  func.func @transform_1(%arg0: i32) -> (i32, i32) {
    %c0_i32 = arith.constant 0 : i32
    %c0_i32_0 = arith.constant 0 : i32
    return %c0_i32, %arg0 : i32, i32
  }
  func.func @transform_2(%arg0: i32) -> (i32, i32) {
    %c0_i32 = arith.constant 0 : i32
    %c0_i32_0 = arith.constant 0 : i32
    %c0_i32_1 = arith.constant 0 : i32
    return %c0_i32, %c0_i32_0 : i32, i32
  }
  func.func @transform_3(%arg0: i32) -> (i32, i32) {
    %c0_i32 = arith.constant 0 : i32
    %c0_i32_0 = arith.constant 0 : i32
    %c0_i32_1 = arith.constant 0 : i32
    return %c0_i32, %c0_i32_0 : i32, i32
  }
  func.func @transform_4(%arg0: i32) -> (i32, i32) {
    %c0_i32 = arith.constant 0 : i32
    %c0_i32_0 = arith.constant 0 : i32
    return %c0_i32, %arg0 : i32, i32
  }
}

module attributes {stable_mosaic.version = 11 : i64} {
  func.func @_window_max_kernel(%arg0: i32, %arg1: memref<9x256xf32, #tpu.memory_space<vmem>>, %arg2: memref<1x256xf32, #tpu.memory_space<vmem>>) attributes {dimension_semantics = [#tpu.dimension_semantics<parallel>], iteration_bounds = array<i64: 1>, scalar_prefetch = 0 : i64, scratch_operands = 0 : i64, tpu.core_type = #tpu.core_type<tc>, window_params = [{transform_indices = @transform_0, window_bounds = array<i64: 9, 256>}, {transform_indices = @transform_1, window_bounds = array<i64: 1, 256>}]} {
    %c0 = arith.constant 0 : index
    %c0_0 = arith.constant 0 : index
    %0 = vector.load %arg1[%c0, %c0_0] : memref<9x256xf32, #tpu.memory_space<vmem>>, vector<9x256xf32>
    %cst = arith.constant dense<0xFF800000> : vector<256xf32>
    %1 = vector.multi_reduction <maximumf>, %0, %cst [0] : vector<9x256xf32> to vector<256xf32>
    %2 = vector.shape_cast %1 : vector<256xf32> to vector<1x256xf32>
    %c0_1 = arith.constant 0 : index
    %c0_2 = arith.constant 0 : index
    %3 = vector.load %arg2[%c0_1, %c0_2] : memref<1x256xf32, #tpu.memory_space<vmem>>, vector<1x256xf32>
    tpu.vector_store %arg2[%c0_1, %c0_2], %2 {strides = array<i32>} : memref<1x256xf32, #tpu.memory_space<vmem>>, vector<1x256xf32>,
    return
  }
  func.func @transform_0(%arg0: i32) -> (i32, i32) {
    %c0_i32 = arith.constant 0 : i32
    %c0_i32_0 = arith.constant 0 : i32
    return %c0_i32, %arg0 : i32, i32
  }
  func.func @transform_1(%arg0: i32) -> (i32, i32) {
    %c0_i32 = arith.constant 0 : i32
    %c0_i32_0 = arith.constant 0 : i32
    return %c0_i32, %arg0 : i32, i32
  }
}

module attributes {stable_mosaic.version = 11 : i64} {
  func.func @_matmul_t_affine_kernel(%arg0: i32, %arg1: memref<8x49xbf16, #tpu.memory_space<vmem>>, %arg2: memref<49x512xbf16, #tpu.memory_space<vmem>>, %arg3: memref<8x1xf32, #tpu.memory_space<vmem>>, %arg4: memref<8x1xf32, #tpu.memory_space<vmem>>, %arg5: memref<8x512xf32, #tpu.memory_space<vmem>>) attributes {dimension_semantics = [#tpu.dimension_semantics<parallel>], iteration_bounds = array<i64: 1>, scalar_prefetch = 0 : i64, scratch_operands = 0 : i64, tpu.core_type = #tpu.core_type<tc>, window_params = [{pipeline_mode = #tpu.pipeline_mode<synchronous>, transform_indices = @transform_0, window_bounds = array<i64: 8, 49>}, {transform_indices = @transform_1, window_bounds = array<i64: 49, 512>}, {pipeline_mode = #tpu.pipeline_mode<synchronous>, transform_indices = @transform_2, window_bounds = array<i64: 8, 1>}, {pipeline_mode = #tpu.pipeline_mode<synchronous>, transform_indices = @transform_3, window_bounds = array<i64: 8, 1>}, {transform_indices = @transform_4, window_bounds = array<i64: 8, 512>}]} {
    %c0 = arith.constant 0 : index
    %c0_0 = arith.constant 0 : index
    %0 = vector.load %arg2[%c0, %c0_0] : memref<49x512xbf16, #tpu.memory_space<vmem>>, vector<49x512xbf16>
    %c0_1 = arith.constant 0 : index
    %c0_2 = arith.constant 0 : index
    %1 = vector.load %arg1[%c0_1, %c0_2] : memref<8x49xbf16, #tpu.memory_space<vmem>>, vector<8x49xbf16>
    %cst = arith.constant dense<0.000000e+00> : vector<8x512xf32>
    %2 = tpu.matmul %1, %0, %cst {dimension_numbers = #tpu.dot_dimension_numbers<[1], [0], [0], [1], [0, 0, 1, 1], [], []>} : vector<8x49xbf16>, vector<49x512xbf16>, vector<8x512xf32> -> vector<8x512xf32>
    %c0_3 = arith.constant 0 : index
    %c0_4 = arith.constant 0 : index
    %3 = vector.load %arg3[%c0_3, %c0_4] : memref<8x1xf32, #tpu.memory_space<vmem>>, vector<8x1xf32>
    %4 = vector.broadcast %3 : vector<8x1xf32> to vector<8x512xf32>
    %5 = arith.mulf %2, %4 : vector<8x512xf32>
    %c0_5 = arith.constant 0 : index
    %c0_6 = arith.constant 0 : index
    %6 = vector.load %arg4[%c0_5, %c0_6] : memref<8x1xf32, #tpu.memory_space<vmem>>, vector<8x1xf32>
    %7 = vector.broadcast %6 : vector<8x1xf32> to vector<8x512xf32>
    %8 = arith.addf %5, %7 : vector<8x512xf32>
    %cst_7 = arith.constant 0.000000e+00 : f32
    %9 = vector.broadcast %cst_7 : f32 to vector<8x512xf32>
    %10 = arith.maximumf %8, %9 : vector<8x512xf32>
    %c0_8 = arith.constant 0 : index
    %c0_9 = arith.constant 0 : index
    %11 = vector.load %arg5[%c0_8, %c0_9] : memref<8x512xf32, #tpu.memory_space<vmem>>, vector<8x512xf32>
    tpu.vector_store %arg5[%c0_8, %c0_9], %10 {strides = array<i32>} : memref<8x512xf32, #tpu.memory_space<vmem>>, vector<8x512xf32>,
    return
  }
  func.func @transform_0(%arg0: i32) -> (i32, i32) {
    %c0_i32 = arith.constant 0 : i32
    %c0_i32_0 = arith.constant 0 : i32
    %c0_i32_1 = arith.constant 0 : i32
    return %c0_i32, %c0_i32_0 : i32, i32
  }
  func.func @transform_1(%arg0: i32) -> (i32, i32) {
    %c0_i32 = arith.constant 0 : i32
    %c0_i32_0 = arith.constant 0 : i32
    return %c0_i32, %arg0 : i32, i32
  }
  func.func @transform_2(%arg0: i32) -> (i32, i32) {
    %c0_i32 = arith.constant 0 : i32
    %c0_i32_0 = arith.constant 0 : i32
    %c0_i32_1 = arith.constant 0 : i32
    return %c0_i32, %c0_i32_0 : i32, i32
  }
  func.func @transform_3(%arg0: i32) -> (i32, i32) {
    %c0_i32 = arith.constant 0 : i32
    %c0_i32_0 = arith.constant 0 : i32
    %c0_i32_1 = arith.constant 0 : i32
    return %c0_i32, %c0_i32_0 : i32, i32
  }
  func.func @transform_4(%arg0: i32) -> (i32, i32) {
    %c0_i32 = arith.constant 0 : i32
    %c0_i32_0 = arith.constant 0 : i32
    return %c0_i32, %arg0 : i32, i32
  }
}

</mosaic_0001>

<bundles_post_ra>
// kernel: _lambda_.24
= control target key start
LH: loop header
LB: loop body
LE: loop exit
PB: predicated region body
PF: predicated region fallthrough
CT: control target
= control target key end

     0   :  { %v494_v2 = vmov 0   ;;  %vm257_vm0 = vcmask 1040384   ;;  %vm258_vm1 = vcmask 1041408   ;;  %v495_v36 = vmov 65535   ;;  %s657_s1 = inlined_call_operand.vmem [shape: bf16[147,512], index: 1, kind: input, shape index: {}]   ;;  %s658_s0 = inlined_call_operand.vmem [shape: bf16[8,147], index: 0, kind: input, shape index: {}]   ;;  %s659_s2 = inlined_call_operand.vmem [shape: f32[8,1], index: 2, kind: input, shape index: {}]   ;;  %s660_s3 = inlined_call_operand.vmem [shape: f32[8,1], index: 3, kind: input, shape index: {}]   ;;  %s661_s4 = inlined_call_operand.vmem [shape: f32[8,512], index: 4, kind: output, shape index: {}]  }
   0x1   :  { %v434_v0 = vld [vmem:[%s657_s1 + $0x4] ss:$16 sps:$4 sm:$0xff]   ;;  %v436_v1 = vld [vmem:[%s657_s1 + $0xc] ss:$16 sps:$4 sm:$0xff]   ;;  %433 = vset.pattern.permute.xlu0 %v494_v2  ;;  %v438_v3 = vld [vmem:[%s657_s1] ss:$16 sps:$4 sm:$0xff]  }
   0x2   :  { %273 = vmatprep.subr.bf16.mxu0 %v434_v0  ;;  %v439_v4 = vld [vmem:[%s657_s1 + $0x8] ss:$16 sps:$4 sm:$0xff]   ;;  %314 = vmatprep.subr.bf16.mxu1 %v436_v1  ;;  %v440_v5 = vld [vmem:[%s657_s1 + $0x24] ss:$16 sps:$4 sm:$0xff]   ;;  %v442_v6 = vld [vmem:[%s657_s1 + $0x2c] ss:$16 sps:$4 sm:$0xff]  }
   0x3   :  { %274 = vmatpush1.bf16.msra.mxu0 %v438_v3  ;;  %315 = vmatpush1.bf16.msra.mxu1 %v439_v4  ;;  %v444_v7 = vld [vmem:[%s657_s1 + $0x20] ss:$16 sps:$4 sm:$0xff]   ;;  %v445_v8 = vld [vmem:[%s657_s1 + $0x28] ss:$16 sps:$4 sm:$0xff]   ;;  %v446_v9 = vld [vmem:[%s657_s1 + $0x44] ss:$16 sps:$4 sm:$0xff]  }
   0x4   :  { %275 = vmatprep.subr.bf16.mxu0 %v440_v5  ;;  %316 = vmatprep.subr.bf16.mxu1 %v442_v6  ;;  %v448_v10 = vld [vmem:[%s657_s1 + $0x4c] ss:$16 sps:$4 sm:$0xff]   ;;  %v450_v11 = vld [vmem:[%s657_s1 + $0x40] ss:$16 sps:$4 sm:$0xff]   ;;  %v451_v12 = vld [vmem:[%s657_s1 + $0x48] ss:$16 sps:$4 sm:$0xff]  }
   0x5   :  { %v452_v13 = vld [vmem:[%s657_s1 + $0x64] ss:$16 sps:$4 sm:$0xff]   ;;  %v454_v14 = vld [vmem:[%s657_s1 + $0x6c] ss:$16 sps:$4 sm:$0xff]   ;;  %v456_v15 = vld [vmem:[%s657_s1 + $0x60] ss:$16 sps:$4 sm:$0xff]  }
   0x6   :  { %v457_v16 = vld [vmem:[%s657_s1 + $0x68] ss:$16 sps:$4 sm:$0xff]   ;;  %v458_v17 = vld [vmem:[%s657_s1 + $0x84] ss:$16 sps:$4 sm:$0xff]   ;;  %v460_v18 = vld [vmem:[%s657_s1 + $0x8c] ss:$16 sps:$4 sm:$0xff]  }
   0x7   :  { %276 = vmatpush1.bf16.msra.mxu0 %v444_v7  ;;  %317 = vmatpush1.bf16.msra.mxu1 %v445_v8  ;;  %v462_v19 = vld [vmem:[%s657_s1 + $0x80] ss:$16 sps:$4 sm:$0xff]   ;;  %v463_v20 = vld [vmem:[%s657_s1 + $0x88] ss:$16 sps:$4 sm:$0xff]   ;;  %v464_v21 = vld [vmem:[%s657_s1 + $0xa4] ss:$16 sps:$4 sm:$0xff]  }
   0x8   :  { %277 = vmatprep.subr.bf16.mxu0 %v446_v9  ;;  %318 = vmatprep.subr.bf16.mxu1 %v448_v10  ;;  %v466_v22 = vld [vmem:[%s657_s1 + $0xac] ss:$16 sps:$4 sm:$0xff]   ;;  %v468_v23 = vld [vmem:[%s657_s1 + $0xa0] ss:$16 sps:$4 sm:$0xff]   ;;  %v469_v24 = vld [vmem:[%s657_s1 + $0xa8] ss:$16 sps:$4 sm:$0xff]  }
   0x9   :  { %v470_v25 = vld [vmem:[%s657_s1 + $0xc4] ss:$16 sps:$4 sm:$0xff]   ;;  %v472_v26 = vld [vmem:[%s657_s1 + $0xcc] ss:$16 sps:$4 sm:$0xff]   ;;  %v474_v27 = vld [vmem:[%s657_s1 + $0xc0] ss:$16 sps:$4 sm:$0xff]  }
   0xa   :  { %v475_v28 = vld [vmem:[%s657_s1 + $0xc8] ss:$16 sps:$4 sm:$0xff]   ;;  %v56_v29 = vld [vmem:[%s658_s0] sm:$0xff]  ;;  %v478_v31 = vld [vmem:[%s657_s1 + $0xec] ss:$16 sps:$4 sm:$0xff]   ;;  %v259_v37 = vsel %vm257_vm0, 4294967295, %v495_v36 }
   0xb   :  { %278 = vmatpush1.bf16.msra.mxu0 %v450_v11  ;;  %319 = vmatpush1.bf16.msra.mxu1 %v451_v12  ;;  %v476_v30 = vld [vmem:[%s657_s1 + $0xe4] ss:$16 sps:$4 sm:$0xff]   ;;  %v55_v34 = vld [vmem:[%s657_s1 + $0x128] sm:$0x33]  ;;  %v388_v35 = vcombine.high %v56_v29, %v56_v29  ;;  %vm253_vm2 = vcmask 154624   ;;  %v260_v45 = vsel %vm258_vm1, %v259_v37, 0  ;;  %v387_v54 = vcombine.low %v56_v29, %v56_v29 }
   0xc   :  { %279 = vmatprep.subr.bf16.mxu0 %v452_v13  ;;  %320 = vmatprep.subr.bf16.mxu1 %v454_v14  ;;  %v355_v32 = vld [vmem:[%s659_s2] sm:$0xff]  ;;  %v481_v39 = vld [vmem:[%s657_s1 + $0xe8] ss:$16 sps:$4 sm:$0xff]   ;;  %v484_v42 = vld [vmem:[%s657_s1 + $0x10c] ss:$16 sps:$4 sm:$0xff]   ;;  %v428_v44 = vcombine.high %v55_v34, %v55_v34  ;;  %v427_v49 = vcombine.low %v55_v34, %v55_v34 }
   0xd   :  { %v54_v33 = vld [vmem:[%s657_s1 + $0x120] sm:$0x33]  ;;  %358 = vperm.xlu0 %433, %v355_v32   ;;  %429 = vmatprep.mubr.msk.bf16.mxu0 %vm253_vm2, %v388_v35  ;;  %v487_v47 = vld [vmem:[%s657_s1 + $0x108] ss:$16 sps:$4 sm:$0xff]  }
   0xe   :  { %v480_v38 = vld [vmem:[%s657_s1 + $0xe0] ss:$16 sps:$4 sm:$0xff]   ;;  %v482_v41 = vld [vmem:[%s657_s1 + $0x104] ss:$16 sps:$4 sm:$0xff]   ;;  %v426_v43 = vcombine.high %v54_v33, %v54_v33  ;;  %430 = vmatprep.mubr.msk.bf16.mxu1 %vm253_vm2, %v388_v35  ;;  %v425_v48 = vcombine.low %v54_v33, %v54_v33  ;;  %v271_v51 = vand.u32 %v428_v44, %v260_v45  ;;  %v268_v53 = vand.u32 %v427_v49, %v260_v45 }
   0xf   :  { %280 = vmatpush1.bf16.msra.mxu0 %v456_v15  ;;  %321 = vmatpush1.bf16.msra.mxu1 %v457_v16  ;;  %v365_v40 = vld [vmem:[%s660_s3] sm:$0xff] }
  0x10   :  { %281 = vmatprep.subr.bf16.mxu0 %v458_v17  ;;  %322 = vmatprep.subr.bf16.mxu1 %v460_v18  ;;  %v486_v46 = vld [vmem:[%s657_s1 + $0x100] ss:$16 sps:$4 sm:$0xff]   ;;  %v265_v50 = vand.u32 %v426_v43, %v260_v45  ;;  %v262_v52 = vand.u32 %v425_v48, %v260_v45 }
  0x11   :  { %368 = vperm.xlu0 %433, %v365_v40  }
  0x13   :  { %282 = vmatpush1.bf16.msra.mxu0 %v462_v19  ;;  %323 = vmatpush1.bf16.msra.mxu1 %v463_v20 }
  0x14   :  { %283 = vmatprep.subr.bf16.mxu0 %v464_v21  ;;  %324 = vmatprep.subr.bf16.mxu1 %v466_v22 }
  0x17   :  { %284 = vmatpush1.bf16.msra.mxu0 %v468_v23  ;;  %325 = vmatpush1.bf16.msra.mxu1 %v469_v24 }
  0x18   :  { %285 = vmatprep.subr.bf16.mxu0 %v470_v25  ;;  %326 = vmatprep.subr.bf16.mxu1 %v472_v26 }
  0x1b   :  { %286 = vmatpush1.bf16.msra.mxu0 %v474_v27  ;;  %327 = vmatpush1.bf16.msra.mxu1 %v475_v28 }
  0x1c   :  { %287 = vmatprep.subr.bf16.mxu0 %v476_v30  ;;  %328 = vmatprep.subr.bf16.mxu1 %v478_v31 }
  0x1f   :  { %288 = vmatpush1.bf16.msra.mxu0 %v480_v38  ;;  %329 = vmatpush1.bf16.msra.mxu1 %v481_v39 }
  0x20   :  { %289 = vmatprep.subr.bf16.mxu0 %v482_v41  ;;  %330 = vmatprep.subr.bf16.mxu1 %v484_v42 }
  0x23   :  { %290 = vmatpush1.bf16.msra.mxu0 %v486_v46  ;;  %331 = vmatpush1.bf16.msra.mxu1 %v487_v47 }
  0x24   :  { %291 = vmatprep.subr.bf16.mxu0 %v265_v50  ;;  %332 = vmatprep.subr.bf16.mxu1 %v271_v51 }
  0x27   :  { %292 = vmatpush1.bf16.msra.mxu0 %v262_v52  ;;  %333 = vmatpush1.bf16.msra.mxu1 %v268_v53 }
  0x2a   :  { %306 = vmatmul.mubr.bf16.vlgmr.msra.gmra.mrb[0].mxu0 %v387_v54  ;;  %347 = vmatmul.mubr.bf16.vlgmr.msra.gmra.mrb[0].mxu1 %v387_v54 }
  0x8c   :  { %v359_v55 = vpop.permute.xlu0 %358 }
  0x90   :  { %v369_v56 = vpop.permute.xlu0 %368 }
  0xfd   :  { %v307_v57 = vpop.f32.mrb[0].mxu0  ;;  %v348_v58 = vpop.f32.mrb[0].mxu1 }
  0xfe   :  { %v361_v59 = vmul.f32 %v359_v55, %v307_v57  ;;  %v363_v60 = vmul.f32 %v359_v55, %v348_v58  ;;  %v309_v61 = vpop.f32.mrb[1].mxu0  ;;  %v350_v62 = vpop.f32.mrb[1].mxu1 }
  0xff   :  { %v362_v63 = vmul.f32 %v359_v55, %v309_v61  ;;  %v364_v0 = vmul.f32 %v359_v55, %v350_v62  ;;  %v311_v1 = vpop.f32.mrb[2].mxu0  ;;  %v352_v2 = vpop.f32.mrb[2].mxu1 }
 0x100   :  { %v371_v3 = vadd.f32 %v369_v56, %v361_v59  ;;  %v373_v4 = vadd.f32 %v369_v56, %v363_v60  ;;  %v312_v5 = vpop.f32.mrb[3].mxu0  ;;  %v353_v6 = vpop.f32.mrb[3].mxu1 }
 0x101   :  { %v372_v7 = vadd.f32 %v369_v56, %v362_v63  ;;  %v374_v8 = vadd.f32 %v369_v56, %v364_v0 }
 0x102   :  { %v375_v9 = vmax.f32 %v371_v3, 0.0  ;;  %v377_v10 = vmax.f32 %v373_v4, 0.0 }
 0x103   :  { %v376_v11 = vmax.f32 %v372_v7, 0.0  ;;  %v378_v12 = vmax.f32 %v374_v8, 0.0 }
 0x104   :  { %379 = vst [vmem:[%s661_s4] sm:$0xff] %v375_v9  ;;  %381 = vst [vmem:[%s661_s4 + $0x10] sm:$0xff] %v377_v10 }
 0x105   :  { %380 = vst [vmem:[%s661_s4 + $0x8] sm:$0xff] %v376_v11  ;;  %382 = vst [vmem:[%s661_s4 + $0x18] sm:$0xff] %v378_v12 }

// kernel: _lambda_.25
= control target key start
LH: loop header
LB: loop body
LE: loop exit
PB: predicated region body
PF: predicated region fallthrough
CT: control target
= control target key end

     0   :  { %v104_v0 = vlaneseq  ;;  %v153_v1 = vmov 1966171168   ;;  %vm24_vm0 = vcmask 1040384   ;;  %s231_s0 = inlined_call_operand.vmem [shape: f32[9,1024], index: 0, kind: input, shape index: {}]   ;;  %s232_s1 = inlined_call_operand.vmem [shape: f32[1,1024], index: 1, kind: output, shape index: {}]  }
   0x1   :  { %v102_v2 = vunpack.c.l.s4 %v153_v1  ;;  %v8_v3 = vld [vmem:[%s231_s0] sm:$0xff]  ;;  %v9_v4 = vld [vmem:[%s231_s0 + $0x8] sm:$0xff]  ;;  %v10_v6 = vld [vmem:[%s231_s0 + $0x10] sm:$0xff] }
   0x2   :  { %v105_v5 = vshrl.u32 %v104_v0, 7  ;;  %v11_v7 = vld [vmem:[%s231_s0 + $0x18] sm:$0xff]  ;;  %v16_v8 = vld [vmem:[%s231_s0 + $0x40] sm:$0x1]  ;;  %v17_v10 = vld [vmem:[%s231_s0 + $0x48] sm:$0x1] }
   0x3   :  { %v103_v9 = vunpack.c.0.s8 %v102_v2  ;;  %v18_v11 = vld [vmem:[%s231_s0 + $0x50] sm:$0x1]  ;;  %v19_v12 = vld [vmem:[%s231_s0 + $0x58] sm:$0x1]  ;;  %v12_v13 = vld [vmem:[%s231_s0 + $0x20] sm:$0xff]  ;;  %v25_v19 = vsel %vm24_vm0, %v16_v8, -inf }
   0x4   :  { %v20_v14 = vld [vmem:[%s231_s0 + $0x60] sm:$0x1]  ;;  %v21_v15 = vld [vmem:[%s231_s0 + $0x68] sm:$0x1]  ;;  %v22_v16 = vld [vmem:[%s231_s0 + $0x70] sm:$0x1]  ;;  %v26_v26 = vmax.f32 %v8_v3, %v25_v19 }
   0x5   :  { %v200_v17 = vsub.s32 %v103_v9, %v105_v5  ;;  %v23_v18 = vld [vmem:[%s231_s0 + $0x78] sm:$0x1]  ;;  %v33_v20 = vsel %vm24_vm0, %v17_v10, -inf  ;;  %v41_v21 = vsel %vm24_vm0, %v18_v11, -inf  ;;  %v49_v22 = vsel %vm24_vm0, %v19_v12, -inf  ;;  %v13_v23 = vld [vmem:[%s231_s0 + $0x28] sm:$0xff] }
   0x6   :  { %v14_v24 = vld [vmem:[%s231_s0 + $0x30] sm:$0xff]  ;;  %v15_v25 = vld [vmem:[%s231_s0 + $0x38] sm:$0xff]  ;;  %v34_v27 = vmax.f32 %v9_v4, %v33_v20  ;;  %v42_v28 = vmax.f32 %v10_v6, %v41_v21  ;;  %v50_v29 = vmax.f32 %v11_v7, %v49_v22  ;;  %v57_v30 = vsel %vm24_vm0, %v20_v14, -inf }
   0x7   :  { %v65_v31 = vsel %vm24_vm0, %v21_v15, -inf  ;;  %v73_v32 = vsel %vm24_vm0, %v22_v16, -inf  ;;  %v81_v33 = vsel %vm24_vm0, %v23_v18, -inf  ;;  %v27_v34 = vrot.slane %v26_v26, 4 }
   0x8   :  { %v35_v35 = vrot.slane %v34_v27, 4  ;;  %v43_v36 = vrot.slane %v42_v28, 4  ;;  %v51_v37 = vrot.slane %v50_v29, 4  ;;  %v58_v38 = vmax.f32 %v12_v13, %v57_v30 }
   0x9   :  { %v66_v39 = vmax.f32 %v13_v23, %v65_v31  ;;  %v74_v40 = vmax.f32 %v14_v24, %v73_v32  ;;  %v82_v41 = vmax.f32 %v15_v25, %v81_v33  ;;  %v28_v42 = vmax.f32 %v26_v26, %v27_v34 }
   0xa   :  { %v36_v43 = vmax.f32 %v34_v27, %v35_v35  ;;  %v44_v44 = vmax.f32 %v42_v28, %v43_v36  ;;  %v52_v45 = vmax.f32 %v50_v29, %v51_v37  ;;  %v59_v46 = vrot.slane %v58_v38, 4 }
   0xb   :  { %v67_v47 = vrot.slane %v66_v39, 4  ;;  %v75_v48 = vrot.slane %v74_v40, 4  ;;  %v83_v49 = vrot.slane %v82_v41, 4  ;;  %v29_v50 = vrot.slane %v28_v42, 2 }
   0xc   :  { %v37_v51 = vrot.slane %v36_v43, 2  ;;  %v45_v52 = vrot.slane %v44_v44, 2  ;;  %v53_v53 = vrot.slane %v52_v45, 2  ;;  %v60_v54 = vmax.f32 %v58_v38, %v59_v46 }
   0xd   :  { %v68_v55 = vmax.f32 %v66_v39, %v67_v47  ;;  %v76_v56 = vmax.f32 %v74_v40, %v75_v48  ;;  %v84_v57 = vmax.f32 %v82_v41, %v83_v49  ;;  %v30_v58 = vmax.f32 %v28_v42, %v29_v50 }
   0xe   :  { %v38_v59 = vmax.f32 %v36_v43, %v37_v51  ;;  %v46_v60 = vmax.f32 %v44_v44, %v45_v52  ;;  %v54_v61 = vmax.f32 %v52_v45, %v53_v53  ;;  %v61_v62 = vrot.slane %v60_v54, 2 }
   0xf   :  { %v69_v63 = vrot.slane %v68_v55, 2  ;;  %v77_v0 = vrot.slane %v76_v56, 2  ;;  %v85_v1 = vrot.slane %v84_v57, 2  ;;  %v31_v2 = vrot.slane %v30_v58, 1 }
  0x10   :  { %v39_v3 = vrot.slane %v38_v59, 1  ;;  %v47_v4 = vrot.slane %v46_v60, 1  ;;  %v55_v5 = vrot.slane %v54_v61, 1  ;;  %v62_v6 = vmax.f32 %v60_v54, %v61_v62 }
  0x11   :  { %v70_v7 = vmax.f32 %v68_v55, %v69_v63  ;;  %v78_v8 = vmax.f32 %v76_v56, %v77_v0  ;;  %v86_v9 = vmax.f32 %v84_v57, %v85_v1  ;;  %v32_v10 = vmax.f32 %v30_v58, %v31_v2 }
  0x12   :  { %v40_v11 = vmax.f32 %v38_v59, %v39_v3  ;;  %v48_v12 = vmax.f32 %v46_v60, %v47_v4  ;;  %v56_v13 = vmax.f32 %v54_v61, %v55_v5  ;;  %v63_v14 = vrot.slane %v62_v6, 1 }
  0x13   :  { %v71_v15 = vrot.slane %v70_v7, 1  ;;  %v79_v16 = vrot.slane %v78_v8, 1  ;;  %v87_v18 = vrot.slane %v86_v9, 1 }
  0x14   :  { %v97_v19 = vcombine.low %v32_v10, %v40_v11  ;;  %v98_v20 = vcombine.low %v48_v12, %v56_v13  ;;  %v64_v21 = vmax.f32 %v62_v6, %v63_v14 }
  0x15   :  { %v72_v22 = vmax.f32 %v70_v7, %v71_v15  ;;  %v80_v23 = vmax.f32 %v78_v8, %v79_v16  ;;  %v88_v24 = vmax.f32 %v86_v9, %v87_v18 }
  0x16   :  { %v107_v25 = vrot.slane %v97_v19, %v200_v17  ;;  %v114_v26 = vrot.slane %v98_v20, %v200_v17 }
  0x17   :  { %v99_v27 = vcombine.low %v64_v21, %v72_v22  ;;  %v100_v28 = vcombine.low %v80_v23, %v88_v24 }
  0x18   :  { %v129_v29 = vcombine.low %v107_v25, %v114_v26 }
  0x19   :  { %v121_v30 = vrot.slane %v99_v27, %v200_v17  ;;  %v128_v31 = vrot.slane %v100_v28, %v200_v17 }
  0x1a   :  { %v137_v33 = vrot.slane %v129_v29, %v200_v17 }
  0x1b   :  { %v130_v32 = vcombine.low %v121_v30, %v128_v31 }
  0x1d   :  { %v144_v34 = vrot.slane %v130_v32, %v200_v17 }
  0x1f   :  { %v145_v35 = vcombine.low %v137_v33, %v144_v34 }
  0x21   :  { %147 = vst [vmem:[%s232_s1] sm:$0xff] %v145_v35 }

// kernel: _lambda_.26
= control target key start
LH: loop header
LB: loop body
LE: loop exit
PB: predicated region body
PF: predicated region fallthrough
CT: control target
= control target key end

     0   :  { %vm31_vm0 = vcmask 1043456   ;;  %v126_v0 = vmov 0.0   ;;  %vm127_vm1 = vmmov 0   ;;  %v128_v2 = vmov 0   ;;  %s179_s1 = inlined_call_operand.vmem [shape: bf16[8,128], index: 1, kind: input, shape index: {}]   ;;  %s180_s0 = inlined_call_operand.vmem [shape: bf16[16,8], index: 0, kind: input, shape index: {}]   ;;  %s181_s2 = inlined_call_operand.vmem [shape: f32[16,1], index: 2, kind: input, shape index: {}]   ;;  %s182_s3 = inlined_call_operand.vmem [shape: f32[16,1], index: 3, kind: input, shape index: {}]   ;;  %s183_s4 = inlined_call_operand.vmem [shape: f32[16,128], index: 4, kind: output, shape index: {}]  }
   0x1   :  { %114 = vmatprep.subr.bf16.mxu0 %v126_v0  ;;  %v18_v1 = vld [vmem:[%s179_s1] sm:$0xf]  ;;  %116 = vmatprep.mubr.msk.bf16.mxu0 %vm127_vm1, %v126_v0  ;;  %v77_v8 = vld [vmem:[%s181_s2 + $0x8] sm:$0xff]  ;;  %vm27_vm2 = vcmask 64512  }
   0x2   :  { %v19_v3 = vmax.bf16 %v128_v2, %v18_v1  ;;  %123 = vset.pattern.permute.xlu0 %v128_v2  ;;  %v76_v4 = vld [vmem:[%s181_s2] sm:$0xff]  ;;  %124 = vset.pattern.permute.xlu1 %v128_v2  ;;  %v91_v9 = vld [vmem:[%s182_s3 + $0x8] sm:$0xff] }
   0x3   :  { %v90_v5 = vld [vmem:[%s182_s3] sm:$0xff]  ;;  %80 = vperm.xlu0 %123, %v76_v4  }
   0x4   :  { %94 = vperm.xlu1 %124, %v90_v5   ;;  %v33_v6 = vsel %vm31_vm0, %v19_v3, 0  ;;  %v125_v7 = vld [vmem:[%s180_s0] sm:$0xff]  }
   0x5   :  { %115 = vmatpush3.bf16.msra.mxu0 %v33_v6 }
   0x7   :  { %85 = vperm.xlu0 %123, %v77_v8  }
   0x8   :  { %99 = vperm.xlu1 %124, %v91_v9   ;;  %117 = vmatmul.mubr.msk.bf16.vlgmr.msra.gmra.mrb[0].mxu0 %vm27_vm2, %v125_v7 }
  0x82   :  { %v81_v10 = vpop.permute.xlu0 %80 }
  0x83   :  { %v95_v11 = vpop.permute.xlu1 %94 }
  0x86   :  { %v86_v15 = vpop.permute.xlu0 %85 }
  0x87   :  { %v100_v20 = vpop.permute.xlu1 %99 }
  0xdb   :  { %v69_v12 = vpop.f32.mrb[0].mxu0 }
  0xdc   :  { %v88_v13 = vmul.f32 %v81_v10, %v69_v12  ;;  %v118_v14 = vpop.f32.mrb[1].mxu0 }
  0xdd   :  { %v72_v16 = vpop.f32.mrb[2].mxu0 }
  0xde   :  { %v102_v17 = vadd.f32 %v95_v11, %v88_v13  ;;  %v89_v18 = vmul.f32 %v86_v15, %v72_v16  ;;  %v119_v19 = vpop.f32.mrb[3].mxu0 }
  0xe0   :  { %104 = vst [vmem:[%s183_s4] sm:$0xff] %v102_v17  ;;  %v103_v21 = vadd.f32 %v100_v20, %v89_v18 }
  0xe2   :  { %105 = vst [vmem:[%s183_s4 + $0x8] sm:$0xff] %v103_v21 }

// kernel: _lambda_.30
= control target key start
LH: loop header
LB: loop body
LE: loop exit
PB: predicated region body
PF: predicated region fallthrough
CT: control target
= control target key end

     0   :  { %vm16_vm0 = vcmask 1040384   ;;  %v88_v22 = vmov 1966171168   ;;  %v58_v24 = vlaneseq  ;;  %s126_s0 = inlined_call_operand.vmem [shape: f32[9,512], index: 0, kind: input, shape index: {}]   ;;  %s127_s1 = inlined_call_operand.vmem [shape: f32[1,512], index: 1, kind: output, shape index: {}]  }
   0x1   :  { %v8_v0 = vld [vmem:[%s126_s0] sm:$0xff]  ;;  %v9_v1 = vld [vmem:[%s126_s0 + $0x8] sm:$0xff]  ;;  %v10_v2 = vld [vmem:[%s126_s0 + $0x10] sm:$0xff]  ;;  %v56_v23 = vunpack.c.l.s4 %v88_v22 }
   0x2   :  { %v11_v3 = vld [vmem:[%s126_s0 + $0x18] sm:$0xff]  ;;  %v12_v4 = vld [vmem:[%s126_s0 + $0x20] sm:$0x1]  ;;  %v13_v5 = vld [vmem:[%s126_s0 + $0x28] sm:$0x1]  ;;  %v59_v34 = vshrl.u32 %v58_v24, 7 }
   0x3   :  { %v14_v6 = vld [vmem:[%s126_s0 + $0x30] sm:$0x1]  ;;  %v15_v7 = vld [vmem:[%s126_s0 + $0x38] sm:$0x1]  ;;  %v17_v8 = vsel %vm16_vm0, %v12_v4, -inf  ;;  %v25_v9 = vsel %vm16_vm0, %v13_v5, -inf  ;;  %v57_v33 = vunpack.c.0.s8 %v56_v23 }
   0x4   :  { %v18_v10 = vmax.f32 %v8_v0, %v17_v8  ;;  %v26_v11 = vmax.f32 %v9_v1, %v25_v9  ;;  %v33_v12 = vsel %vm16_vm0, %v14_v6, -inf  ;;  %v41_v13 = vsel %vm16_vm0, %v15_v7, -inf }
   0x5   :  { %v34_v14 = vmax.f32 %v10_v2, %v33_v12  ;;  %v42_v15 = vmax.f32 %v11_v3, %v41_v13  ;;  %v60_v43 = vsub.s32 %v57_v33, %v59_v34  ;;  %vm80_vm1 = vcmp.lt.s32.totalorder %v58_v24, 512 }
   0x6   :  { %v19_v16 = vrot.slane %v18_v10, 4  ;;  %v27_v17 = vrot.slane %v26_v11, 4 }
   0x7   :  { %v35_v18 = vrot.slane %v34_v14, 4  ;;  %v43_v19 = vrot.slane %v42_v15, 4 }
   0x8   :  { %v20_v20 = vmax.f32 %v18_v10, %v19_v16  ;;  %v28_v21 = vmax.f32 %v26_v11, %v27_v17 }
   0x9   :  { %v36_v25 = vmax.f32 %v34_v14, %v35_v18  ;;  %v44_v26 = vmax.f32 %v42_v15, %v43_v19 }
   0xa   :  { %v21_v27 = vrot.slane %v20_v20, 2  ;;  %v29_v28 = vrot.slane %v28_v21, 2 }
   0xb   :  { %v37_v29 = vrot.slane %v36_v25, 2  ;;  %v45_v30 = vrot.slane %v44_v26, 2 }
   0xc   :  { %v22_v31 = vmax.f32 %v20_v20, %v21_v27  ;;  %v30_v32 = vmax.f32 %v28_v21, %v29_v28 }
   0xd   :  { %v38_v35 = vmax.f32 %v36_v25, %v37_v29  ;;  %v46_v36 = vmax.f32 %v44_v26, %v45_v30 }
   0xe   :  { %v23_v37 = vrot.slane %v22_v31, 1  ;;  %v31_v38 = vrot.slane %v30_v32, 1 }
   0xf   :  { %v39_v39 = vrot.slane %v38_v35, 1  ;;  %v47_v40 = vrot.slane %v46_v36, 1 }
  0x10   :  { %v24_v41 = vmax.f32 %v22_v31, %v23_v37  ;;  %v32_v42 = vmax.f32 %v30_v32, %v31_v38 }
  0x11   :  { %v40_v44 = vmax.f32 %v38_v35, %v39_v39  ;;  %v48_v45 = vmax.f32 %v46_v36, %v47_v40 }
  0x12   :  { %v53_v46 = vcombine.low %v24_v41, %v32_v42 }
  0x13   :  { %v54_v47 = vcombine.low %v40_v44, %v48_v45 }
  0x14   :  { %v61_v48 = vrot.slane %v53_v46, %v60_v43 }
  0x15   :  { %v68_v49 = vrot.slane %v54_v47, %v60_v43 }
  0x17   :  { %v69_v50 = vcombine.low %v61_v48, %v68_v49 }
  0x19   :  { %v76_v51 = vrot.slane %v69_v50, %v60_v43 }
  0x1b   :  { %82 = vst.msk [vmem:[%s127_s1] sm:$0xf] %vm80_vm1, %v76_v51 }

// kernel: _lambda_.28
= control target key start
LH: loop header
LB: loop body
LE: loop exit
PB: predicated region body
PF: predicated region fallthrough
CT: control target
= control target key end

     0   :  { %v145_v0 = vmov 0.0   ;;  %vm146_vm0 = vmmov 0   ;;  %v147_v4 = vmov 0   ;;  %vm45_vm1 = vcmask 261120   ;;  %s206_s1 = inlined_call_operand.vmem [shape: bf16[32,128], index: 1, kind: input, shape index: {}]   ;;  %s207_s2 = inlined_call_operand.vmem [shape: f32[16,1], index: 2, kind: input, shape index: {}]   ;;  %s208_s3 = inlined_call_operand.vmem [shape: f32[16,1], index: 3, kind: input, shape index: {}]   ;;  %s209_s0 = inlined_call_operand.vmem [shape: bf16[16,32], index: 0, kind: input, shape index: {}]   ;;  %s210_s4 = inlined_call_operand.vmem [shape: f32[16,128], index: 4, kind: output, shape index: {}]  }
   0x1   :  { %131 = vmatprep.subr.bf16.mxu0 %v145_v0  ;;  %v18_v1 = vld [vmem:[%s206_s1] sm:$0xf]  ;;  %v19_v2 = vld [vmem:[%s206_s1 + $0x4] sm:$0xf]  ;;  %v20_v3 = vld [vmem:[%s206_s1 + $0x8] sm:$0xf]  ;;  %135 = vmatprep.mubr.msk.bf16.mxu0 %vm146_vm0, %v145_v0 }
   0x2   :  { %v22_v5 = vmax.bf16 %v147_v4, %v18_v1  ;;  %v23_v6 = vmax.bf16 %v147_v4, %v19_v2  ;;  %v21_v7 = vld [vmem:[%s206_s1 + $0xc] sm:$0xf]  ;;  %v24_v8 = vmax.bf16 %v147_v4, %v20_v3  ;;  %142 = vset.pattern.permute.xlu0 %v147_v4  ;;  %143 = vset.pattern.permute.xlu1 %v147_v4  ;;  %v90_v10 = vld [vmem:[%s207_s2] sm:$0xff] }
   0x3   :  { %v25_v9 = vmax.bf16 %v147_v4, %v21_v7  ;;  %v104_v11 = vld [vmem:[%s208_s3] sm:$0xff]  ;;  %94 = vperm.xlu0 %142, %v90_v10   ;;  %v91_v13 = vld [vmem:[%s207_s2 + $0x8] sm:$0xff] }
   0x4   :  { %v125_v12 = vcombine.low %v22_v5, %v23_v6  ;;  %108 = vperm.xlu1 %143, %v104_v11   ;;  %v105_v14 = vld [vmem:[%s208_s3 + $0x8] sm:$0xff]  ;;  %v144_v16 = vld [vmem:[%s209_s0] sm:$0xff]  }
   0x5   :  { %v126_v15 = vcombine.low %v24_v8, %v25_v9 }
   0x6   :  { %132 = vmatpush3.bf16.msra.mxu0 %v125_v12 }
   0x7   :  { %133 = vmatprep.subr.bf16.mxu0 %v145_v0  ;;  %99 = vperm.xlu0 %142, %v91_v13  }
   0x8   :  { %113 = vperm.xlu1 %143, %v105_v14  }
   0xa   :  { %134 = vmatpush3.bf16.msra.mxu0 %v126_v15 }
   0xd   :  { %136 = vmatmul.mubr.msk.bf16.vlgmr.msra.gmra.mrb[0].mxu0 %vm45_vm1, %v144_v16 }
  0x82   :  { %v95_v17 = vpop.permute.xlu0 %94 }
  0x83   :  { %v109_v18 = vpop.permute.xlu1 %108 }
  0x86   :  { %v100_v22 = vpop.permute.xlu0 %99 }
  0x87   :  { %v114_v27 = vpop.permute.xlu1 %113 }
  0xe0   :  { %v83_v19 = vpop.f32.mrb[0].mxu0 }
  0xe1   :  { %v102_v20 = vmul.f32 %v95_v17, %v83_v19  ;;  %v137_v21 = vpop.f32.mrb[1].mxu0 }
  0xe2   :  { %v86_v23 = vpop.f32.mrb[2].mxu0 }
  0xe3   :  { %v116_v24 = vadd.f32 %v109_v18, %v102_v20  ;;  %v103_v25 = vmul.f32 %v100_v22, %v86_v23  ;;  %v138_v26 = vpop.f32.mrb[3].mxu0 }
  0xe5   :  { %118 = vst [vmem:[%s210_s4] sm:$0xff] %v116_v24  ;;  %v117_v28 = vadd.f32 %v114_v27, %v103_v25 }
  0xe7   :  { %119 = vst [vmem:[%s210_s4 + $0x8] sm:$0xff] %v117_v28 }

// kernel: _lambda_.32
= control target key start
LH: loop header
LB: loop body
LE: loop exit
PB: predicated region body
PF: predicated region fallthrough
CT: control target
= control target key end

     0   :  { %vm52_vm0 = vcmask 261120   ;;  %v195_v3 = vmov 0   ;;  %s277_s1 = inlined_call_operand.vmem [shape: bf16[32,128], index: 1, kind: input, shape index: {}]   ;;  %s278_s0 = inlined_call_operand.vmem [shape: bf16[32,32], index: 0, kind: input, shape index: {}]   ;;  %s279_s2 = inlined_call_operand.vmem [shape: f32[32,1], index: 2, kind: input, shape index: {}]   ;;  %s280_s3 = inlined_call_operand.vmem [shape: f32[32,1], index: 3, kind: input, shape index: {}]   ;;  %s281_s4 = inlined_call_operand.vmem [shape: f32[32,128], index: 4, kind: output, shape index: {}]  }
   0x1   :  { %v18_v0 = vld [vmem:[%s277_s1] sm:$0xf]  ;;  %v19_v1 = vld [vmem:[%s277_s1 + $0x4] sm:$0xf]  ;;  %v20_v2 = vld [vmem:[%s277_s1 + $0x8] sm:$0xf]  ;;  %192 = vset.pattern.permute.xlu1 %v195_v3  ;;  %191 = vset.pattern.permute.xlu0 %v195_v3 }
   0x2   :  { %v22_v4 = vmax.bf16 %v195_v3, %v18_v0  ;;  %v23_v5 = vmax.bf16 %v195_v3, %v19_v1  ;;  %v21_v6 = vld [vmem:[%s277_s1 + $0xc] sm:$0xf]  ;;  %v24_v7 = vmax.bf16 %v195_v3, %v20_v2  ;;  %v193_v9 = vld [vmem:[%s278_s0] sm:$0xff]   ;;  %v110_v11 = vld [vmem:[%s279_s2 + $0x10] sm:$0xff] }
   0x3   :  { %v25_v8 = vmax.bf16 %v195_v3, %v21_v6  ;;  %v108_v12 = vld [vmem:[%s279_s2] sm:$0xff]  ;;  %186 = vmatprep.mubr.msk.bf16.mxu0 %vm52_vm0, %v193_v9  ;;  %124 = vperm.xlu1 %192, %v110_v11   ;;  %v111_v14 = vld [vmem:[%s279_s2 + $0x18] sm:$0xff]  ;;  %v109_v15 = vld [vmem:[%s279_s2 + $0x8] sm:$0xff] }
   0x4   :  { %v174_v10 = vcombine.low %v22_v4, %v23_v5  ;;  %114 = vperm.xlu0 %191, %v108_v12   ;;  %v194_v16 = vld [vmem:[%s278_s0 + $0x8] sm:$0xff]   ;;  %v136_v18 = vld [vmem:[%s280_s3] sm:$0xff]  ;;  %v139_v19 = vld [vmem:[%s280_s3 + $0x18] sm:$0xff] }
   0x5   :  { %v175_v13 = vcombine.low %v24_v7, %v25_v8  ;;  %v137_v17 = vld [vmem:[%s280_s3 + $0x8] sm:$0xff]  ;;  %v138_v20 = vld [vmem:[%s280_s3 + $0x10] sm:$0xff] }
   0x6   :  { %182 = vmatprep.subr.bf16.mxu0 %v174_v10 }
   0x7   :  { %183 = vmatpush3.bf16.msra.mxu0 %v174_v10  ;;  %129 = vperm.xlu1 %192, %v111_v14  }
   0x8   :  { %184 = vmatprep.subr.bf16.mxu0 %v175_v13  ;;  %119 = vperm.xlu0 %191, %v109_v15  }
   0xb   :  { %185 = vmatpush3.bf16.msra.mxu0 %v175_v13  ;;  %147 = vperm.xlu1 %192, %v137_v17  }
   0xc   :  { %142 = vperm.xlu0 %191, %v136_v18  }
   0xe   :  { %187 = vmatmul.mubr.msk.bf16.vlgmr.msra.gmra.mrb[0].mxu0 %vm52_vm0, %v194_v16 }
   0xf   :  { %157 = vperm.xlu1 %192, %v139_v19  }
  0x10   :  { %152 = vperm.xlu0 %191, %v138_v20  }
  0x82   :  { %v125_v22 = vpop.permute.xlu1 %124 }
  0x83   :  { %v115_v21 = vpop.permute.xlu0 %114 }
  0x86   :  { %v130_v24 = vpop.permute.xlu1 %129 }
  0x87   :  { %v120_v23 = vpop.permute.xlu0 %119 }
  0x8a   :  { %v148_v26 = vpop.permute.xlu1 %147 }
  0x8b   :  { %v143_v25 = vpop.permute.xlu0 %142 }
  0x8e   :  { %v158_v36 = vpop.permute.xlu1 %157 }
  0x8f   :  { %v153_v30 = vpop.permute.xlu0 %152 }
  0xe1   :  { %v188_v27 = vpop.f32.mrb[0].mxu0 }
  0xe2   :  { %v134_v28 = vmul.f32 %v188_v27, %v125_v22  ;;  %v93_v29 = vpop.f32.mrb[1].mxu0 }
  0xe3   :  { %v132_v31 = vmul.f32 %v115_v21, %v93_v29  ;;  %v189_v32 = vpop.f32.mrb[2].mxu0 }
  0xe4   :  { %v162_v33 = vadd.f32 %v153_v30, %v134_v28  ;;  %v135_v34 = vmul.f32 %v189_v32, %v130_v24  ;;  %v96_v35 = vpop.f32.mrb[3].mxu0 }
  0xe5   :  { %v160_v37 = vadd.f32 %v143_v25, %v132_v31  ;;  %v133_v38 = vmul.f32 %v120_v23, %v96_v35 }
  0xe6   :  { %166 = vst [vmem:[%s281_s4 + $0x10] sm:$0xff] %v162_v33  ;;  %v163_v39 = vadd.f32 %v158_v36, %v135_v34 }
  0xe7   :  { %164 = vst [vmem:[%s281_s4] sm:$0xff] %v160_v37  ;;  %v161_v40 = vadd.f32 %v148_v26, %v133_v38 }
  0xe8   :  { %167 = vst [vmem:[%s281_s4 + $0x18] sm:$0xff] %v163_v39 }
  0xe9   :  { %165 = vst [vmem:[%s281_s4 + $0x8] sm:$0xff] %v161_v40 }

// kernel: _lambda_.34
= control target key start
LH: loop header
LB: loop body
LE: loop exit
PB: predicated region body
PF: predicated region fallthrough
CT: control target
= control target key end

     0   :  { %v223_v3 = vmov 0   ;;  %vm72_vm0 = vcmask 523264   ;;  %s317_s1 = inlined_call_operand.vmem [shape: bf16[64,128], index: 1, kind: input, shape index: {}]   ;;  %s318_s0 = inlined_call_operand.vmem [shape: bf16[32,64], index: 0, kind: input, shape index: {}]   ;;  %s319_s2 = inlined_call_operand.vmem [shape: f32[32,1], index: 2, kind: input, shape index: {}]   ;;  %s320_s3 = inlined_call_operand.vmem [shape: f32[32,1], index: 3, kind: input, shape index: {}]   ;;  %s321_s4 = inlined_call_operand.vmem [shape: f32[32,128], index: 4, kind: output, shape index: {}]  }
   0x1   :  { %v18_v0 = vld [vmem:[%s317_s1] sm:$0xf]  ;;  %v19_v1 = vld [vmem:[%s317_s1 + $0x4] sm:$0xf]  ;;  %v20_v2 = vld [vmem:[%s317_s1 + $0x8] sm:$0xf]  ;;  %220 = vset.pattern.permute.xlu1 %v223_v3  ;;  %219 = vset.pattern.permute.xlu0 %v223_v3 }
   0x2   :  { %v26_v4 = vmax.bf16 %v223_v3, %v18_v0  ;;  %v27_v5 = vmax.bf16 %v223_v3, %v19_v1  ;;  %v21_v6 = vld [vmem:[%s317_s1 + $0xc] sm:$0xf]  ;;  %v28_v7 = vmax.bf16 %v223_v3, %v20_v2  ;;  %v22_v8 = vld [vmem:[%s317_s1 + $0x10] sm:$0xf]  ;;  %v23_v9 = vld [vmem:[%s317_s1 + $0x14] sm:$0xf] }
   0x3   :  { %v29_v10 = vmax.bf16 %v223_v3, %v21_v6  ;;  %v24_v11 = vld [vmem:[%s317_s1 + $0x18] sm:$0xf]  ;;  %v30_v13 = vmax.bf16 %v223_v3, %v22_v8  ;;  %v31_v14 = vmax.bf16 %v223_v3, %v23_v9  ;;  %v221_v15 = vld [vmem:[%s318_s0] sm:$0xff]   ;;  %v25_v17 = vld [vmem:[%s317_s1 + $0x1c] sm:$0xf] }
   0x4   :  { %v194_v12 = vcombine.low %v26_v4, %v27_v5  ;;  %v130_v18 = vld [vmem:[%s319_s2 + $0x10] sm:$0xff]  ;;  %214 = vmatprep.mubr.msk.bf16.mxu0 %vm72_vm0, %v221_v15  ;;  %v128_v19 = vld [vmem:[%s319_s2] sm:$0xff]  ;;  %v32_v21 = vmax.bf16 %v223_v3, %v24_v11  ;;  %v33_v22 = vmax.bf16 %v223_v3, %v25_v17  ;;  %v131_v23 = vld [vmem:[%s319_s2 + $0x18] sm:$0xff] }
   0x5   :  { %v195_v16 = vcombine.low %v28_v7, %v29_v10  ;;  %144 = vperm.xlu1 %220, %v130_v18   ;;  %v196_v20 = vcombine.low %v30_v13, %v31_v14  ;;  %134 = vperm.xlu0 %219, %v128_v19   ;;  %v129_v24 = vld [vmem:[%s319_s2 + $0x8] sm:$0xff]  ;;  %v156_v27 = vld [vmem:[%s320_s3] sm:$0xff]  ;;  %v159_v28 = vld [vmem:[%s320_s3 + $0x18] sm:$0xff] }
   0x6   :  { %206 = vmatprep.subr.bf16.mxu0 %v194_v12  ;;  %v197_v25 = vcombine.low %v32_v21, %v33_v22  ;;  %v157_v26 = vld [vmem:[%s320_s3 + $0x8] sm:$0xff]  ;;  %v158_v29 = vld [vmem:[%s320_s3 + $0x10] sm:$0xff] }
   0x7   :  { %207 = vmatpush3.bf16.msra.mxu0 %v194_v12  ;;  %v222_v30 = vld [vmem:[%s318_s0 + $0x8] sm:$0xff]  }
   0x8   :  { %208 = vmatprep.subr.bf16.mxu0 %v195_v16 }
   0x9   :  { %149 = vperm.xlu1 %220, %v131_v23   ;;  %139 = vperm.xlu0 %219, %v129_v24  }
   0xb   :  { %209 = vmatpush3.bf16.msra.mxu0 %v195_v16 }
   0xc   :  { %210 = vmatprep.subr.bf16.mxu0 %v196_v20 }
   0xd   :  { %167 = vperm.xlu1 %220, %v157_v26   ;;  %162 = vperm.xlu0 %219, %v156_v27  }
   0xf   :  { %211 = vmatpush3.bf16.msra.mxu0 %v196_v20 }
  0x10   :  { %212 = vmatprep.subr.bf16.mxu0 %v197_v25 }
  0x11   :  { %177 = vperm.xlu1 %220, %v159_v28   ;;  %172 = vperm.xlu0 %219, %v158_v29  }
  0x13   :  { %213 = vmatpush3.bf16.msra.mxu0 %v197_v25 }
  0x16   :  { %215 = vmatmul.mubr.msk.bf16.vlgmr.msra.gmra.mrb[0].mxu0 %vm72_vm0, %v222_v30 }
  0x84   :  { %v135_v31 = vpop.permute.xlu0 %134  ;;  %v145_v32 = vpop.permute.xlu1 %144 }
  0x88   :  { %v140_v33 = vpop.permute.xlu0 %139  ;;  %v150_v34 = vpop.permute.xlu1 %149 }
  0x8c   :  { %v163_v35 = vpop.permute.xlu0 %162  ;;  %v168_v36 = vpop.permute.xlu1 %167 }
  0x90   :  { %v173_v40 = vpop.permute.xlu0 %172  ;;  %v178_v46 = vpop.permute.xlu1 %177 }
  0xe9   :  { %v216_v37 = vpop.f32.mrb[0].mxu0 }
  0xea   :  { %v154_v38 = vmul.f32 %v216_v37, %v145_v32  ;;  %v113_v39 = vpop.f32.mrb[1].mxu0 }
  0xeb   :  { %v152_v41 = vmul.f32 %v135_v31, %v113_v39  ;;  %v217_v42 = vpop.f32.mrb[2].mxu0 }
  0xec   :  { %v182_v43 = vadd.f32 %v173_v40, %v154_v38  ;;  %v155_v44 = vmul.f32 %v217_v42, %v150_v34  ;;  %v116_v45 = vpop.f32.mrb[3].mxu0 }
  0xed   :  { %v180_v47 = vadd.f32 %v163_v35, %v152_v41  ;;  %v153_v48 = vmul.f32 %v140_v33, %v116_v45 }
  0xee   :  { %186 = vst [vmem:[%s321_s4 + $0x10] sm:$0xff] %v182_v43  ;;  %v183_v49 = vadd.f32 %v178_v46, %v155_v44 }
  0xef   :  { %184 = vst [vmem:[%s321_s4] sm:$0xff] %v180_v47  ;;  %v181_v50 = vadd.f32 %v168_v36, %v153_v48 }
  0xf0   :  { %187 = vst [vmem:[%s321_s4 + $0x18] sm:$0xff] %v183_v49 }
  0xf1   :  { %185 = vst [vmem:[%s321_s4 + $0x8] sm:$0xff] %v181_v50 }

// kernel: _lambda_.31
= control target key start
LH: loop header
LB: loop body
LE: loop exit
PB: predicated region body
PF: predicated region fallthrough
CT: control target
= control target key end

     0   :  { %vm42_vm0 = vcmask 130048   ;;  %v181_v2 = vmov 0   ;;  %s257_s1 = inlined_call_operand.vmem [shape: bf16[16,128], index: 1, kind: input, shape index: {}]   ;;  %s258_s0 = inlined_call_operand.vmem [shape: bf16[32,16], index: 0, kind: input, shape index: {}]   ;;  %s259_s2 = inlined_call_operand.vmem [shape: f32[32,1], index: 2, kind: input, shape index: {}]   ;;  %s260_s3 = inlined_call_operand.vmem [shape: f32[32,1], index: 3, kind: input, shape index: {}]   ;;  %s261_s4 = inlined_call_operand.vmem [shape: f32[32,128], index: 4, kind: output, shape index: {}]  }
   0x1   :  { %v18_v0 = vld [vmem:[%s257_s1] sm:$0xf]  ;;  %v19_v1 = vld [vmem:[%s257_s1 + $0x4] sm:$0xf]  ;;  %178 = vset.pattern.permute.xlu1 %v181_v2  ;;  %177 = vset.pattern.permute.xlu0 %v181_v2  ;;  %v100_v6 = vld [vmem:[%s259_s2 + $0x10] sm:$0xff] }
   0x2   :  { %v20_v3 = vmax.bf16 %v181_v2, %v18_v0  ;;  %v21_v4 = vmax.bf16 %v181_v2, %v19_v1  ;;  %v179_v5 = vld [vmem:[%s258_s0] sm:$0xff]   ;;  %114 = vperm.xlu1 %178, %v100_v6   ;;  %v101_v9 = vld [vmem:[%s259_s2 + $0x18] sm:$0xff]  ;;  %v180_v10 = vld [vmem:[%s258_s0 + $0x8] sm:$0xff]  }
   0x3   :  { %172 = vmatprep.mubr.msk.bf16.mxu0 %vm42_vm0, %v179_v5  ;;  %v98_v8 = vld [vmem:[%s259_s2] sm:$0xff]  ;;  %v99_v11 = vld [vmem:[%s259_s2 + $0x8] sm:$0xff]  ;;  %v129_v14 = vld [vmem:[%s260_s3 + $0x18] sm:$0xff] }
   0x4   :  { %v164_v7 = vcombine.low %v20_v3, %v21_v4  ;;  %104 = vperm.xlu0 %177, %v98_v8   ;;  %v127_v12 = vld [vmem:[%s260_s3 + $0x8] sm:$0xff]  ;;  %v126_v13 = vld [vmem:[%s260_s3] sm:$0xff]  ;;  %v128_v15 = vld [vmem:[%s260_s3 + $0x10] sm:$0xff] }
   0x6   :  { %170 = vmatprep.subr.bf16.mxu0 %v164_v7  ;;  %119 = vperm.xlu1 %178, %v101_v9  }
   0x7   :  { %171 = vmatpush3.bf16.msra.mxu0 %v164_v7 }
   0x8   :  { %109 = vperm.xlu0 %177, %v99_v11  }
   0xa   :  { %173 = vmatmul.mubr.msk.bf16.vlgmr.msra.gmra.mrb[0].mxu0 %vm42_vm0, %v180_v10  ;;  %137 = vperm.xlu1 %178, %v127_v12  }
   0xc   :  { %132 = vperm.xlu0 %177, %v126_v13  }
   0xe   :  { %147 = vperm.xlu1 %178, %v129_v14  }
  0x10   :  { %142 = vperm.xlu0 %177, %v128_v15  }
  0x81   :  { %v115_v17 = vpop.permute.xlu1 %114 }
  0x83   :  { %v105_v16 = vpop.permute.xlu0 %104 }
  0x85   :  { %v120_v19 = vpop.permute.xlu1 %119 }
  0x87   :  { %v110_v18 = vpop.permute.xlu0 %109 }
  0x89   :  { %v138_v21 = vpop.permute.xlu1 %137 }
  0x8b   :  { %v133_v20 = vpop.permute.xlu0 %132 }
  0x8d   :  { %v148_v31 = vpop.permute.xlu1 %147 }
  0x8f   :  { %v143_v25 = vpop.permute.xlu0 %142 }
  0xdd   :  { %v174_v22 = vpop.f32.mrb[0].mxu0 }
  0xde   :  { %v124_v23 = vmul.f32 %v174_v22, %v115_v17  ;;  %v83_v24 = vpop.f32.mrb[1].mxu0 }
  0xdf   :  { %v122_v26 = vmul.f32 %v105_v16, %v83_v24  ;;  %v175_v27 = vpop.f32.mrb[2].mxu0 }
  0xe0   :  { %v152_v28 = vadd.f32 %v143_v25, %v124_v23  ;;  %v125_v29 = vmul.f32 %v175_v27, %v120_v19  ;;  %v86_v30 = vpop.f32.mrb[3].mxu0 }
  0xe1   :  { %v150_v32 = vadd.f32 %v133_v20, %v122_v26  ;;  %v123_v33 = vmul.f32 %v110_v18, %v86_v30 }
  0xe2   :  { %156 = vst [vmem:[%s261_s4 + $0x10] sm:$0xff] %v152_v28  ;;  %v153_v34 = vadd.f32 %v148_v31, %v125_v29 }
  0xe3   :  { %154 = vst [vmem:[%s261_s4] sm:$0xff] %v150_v32  ;;  %v151_v35 = vadd.f32 %v138_v21, %v123_v33 }
  0xe4   :  { %157 = vst [vmem:[%s261_s4 + $0x18] sm:$0xff] %v153_v34 }
  0xe5   :  { %155 = vst [vmem:[%s261_s4 + $0x8] sm:$0xff] %v151_v35 }

// kernel: squeeze.16
= control target key start
LH: loop header
LB: loop body
LE: loop exit
PB: predicated region body
PF: predicated region fallthrough
CT: control target
= control target key end

     0   :  { %s1087_s8 = smov 122   ;;  %s1088_s9 = smov 124   ;;  %vm7_vm0 = vcmask 15360   ;;  %s1482_s0 = inlined_call_operand.vmem [shape: f32[256], index: 0, kind: input, shape index: {}]   ;;  %s1483_s1 = inlined_call_operand.vmem [shape: f32[32,2,2,2], index: 1, kind: output, shape index: {}]  }
   0x1   :  { %v4_v0 = vld [vmem:[%s1482_s0] sm:$0x3]  ;;  %s1086_s0 = smov 126   ;;  %s1089_s10 = smov 120  }
   0x2   :  { %5 = vst [vmem:[#allocation1] sm:$0x3] %v4_v0  ;;  %s1090_s11 = smov 118   ;;  %s1091_s12 = smov 116  }
   0x3   :  { %s1092_s13 = smov 114   ;;  %s1093_s14 = smov 112  }
   0x4   :  { %s1094_s15 = smov 110   ;;  %s1095_s16 = smov 108  }
   0x5   :  { %s1096_s17 = smov 106   ;;  %s1097_s18 = smov 104  }
   0x6   :  { %s1098_s19 = smov 102   ;;  %s1099_s20 = smov 100  }
   0x7   :  { %s1100_s21 = smov 98   ;;  %s1101_s22 = smov 96  }
   0x8   :  { %s1102_s23 = smov 94   ;;  %s1103_s24 = smov 92  }
   0x9   :  { %v11_v1 = vld [vmem:[#allocation1] sm:$0x3]   ;;  %s1104_s25 = smov 90   ;;  %s1105_s26 = smov 88  }
   0xa   :  { %v27_v2 = vld [vmem:[#allocation1] sm:$0x3]   ;;  %12 = vrot.lane.b32.xlu0 %v11_v1, %s1086_s0  ;;  %s1106_s27 = smov 86   ;;  %s1107_s28 = smov 84  }
   0xb   :  { %28 = vrot.lane.b32.xlu1 %v27_v2, %s1087_s8  ;;  %v19_v3 = vld [vmem:[#allocation1] sm:$0x3]   ;;  %s1108_s29 = smov 82   ;;  %s1109_s30 = smov 80  }
   0xc   :  { %v35_v4 = vld [vmem:[#allocation1] sm:$0x3]   ;;  %s1110_s2 = smov 78   ;;  %s1111_s3 = smov 76  }
   0xd   :  { %v43_v5 = vld [vmem:[#allocation1] sm:$0x3]   ;;  %s1112_s4 = smov 74   ;;  %s1113_s5 = smov 72  }
   0xe   :  { %20 = vrot.lane.b32.xlu0 %v19_v3, %s1088_s9  ;;  %v51_v6 = vld [vmem:[#allocation1] sm:$0x3]   ;;  %s1114_s6 = smov 70   ;;  %s1115_s7 = smov 68  }
   0xf   :  { %36 = vrot.lane.b32.xlu1 %v35_v4, %s1089_s10  ;;  %v59_v7 = vld [vmem:[#allocation1] sm:$0x3]   ;;  %s1116_s0 = smov 66   ;;  %s1117_s8 = smov 64  }
  0x10   :  { %v67_v8 = vld [vmem:[#allocation1] sm:$0x3]   ;;  %s1118_s9 = smov 62   ;;  %s1119_s10 = smov 60  }
  0x11   :  { %v75_v9 = vld [vmem:[#allocation1] sm:$0x3]  }
  0x12   :  { %44 = vrot.lane.b32.xlu0 %v43_v5, %s1090_s11  ;;  %v83_v10 = vld [vmem:[#allocation1] sm:$0x3]   ;;  %s1120_s11 = smov 58  }
  0x13   :  { %52 = vrot.lane.b32.xlu1 %v51_v6, %s1091_s12  ;;  %v91_v11 = vld [vmem:[#allocation1] sm:$0x3]   ;;  %s1121_s12 = smov 56  }
  0x14   :  { %v99_v12 = vld [vmem:[#allocation1] sm:$0x3]  }
  0x15   :  { %v107_v13 = vld [vmem:[#allocation1] sm:$0x3]  }
  0x16   :  { %60 = vrot.lane.b32.xlu0 %v59_v7, %s1092_s13  ;;  %v115_v14 = vld [vmem:[#allocation1] sm:$0x3]   ;;  %s1122_s13 = smov 54  }
  0x17   :  { %68 = vrot.lane.b32.xlu1 %v67_v8, %s1093_s14  ;;  %v123_v15 = vld [vmem:[#allocation1] sm:$0x3]   ;;  %s1123_s14 = smov 52  }
  0x18   :  { %v131_v16 = vld [vmem:[#allocation1] sm:$0x3]  }
  0x19   :  { %v6_v17 = vld [vmem:[#allocation1] sm:$0x3]  }
  0x1a   :  { %76 = vrot.lane.b32.xlu0 %v75_v9, %s1094_s15  ;;  %8 = vst.msk [vmem:[#allocation0] sm:$0x1] %vm7_vm0, %v6_v17   ;;  %10 = vst.msk [vmem:[#allocation0 + $0xff] sm:$0x2] %vm7_vm0, %v6_v17   ;;  %v139_v18 = vld [vmem:[#allocation1] sm:$0x3]  }
  0x1b   :  { %84 = vrot.lane.b32.xlu1 %v83_v10, %s1095_s16  ;;  %v147_v19 = vld [vmem:[#allocation1] sm:$0x3]   ;;  %s1124_s15 = smov 50   ;;  %s1125_s16 = smov 48  }
  0x1c   :  { %v155_v20 = vld [vmem:[#allocation1] sm:$0x3]  }
  0x1d   :  { %v163_v21 = vld [vmem:[#allocation1] sm:$0x3]  }
  0x1e   :  { %92 = vrot.lane.b32.xlu0 %v91_v11, %s1096_s17  ;;  %v171_v22 = vld [vmem:[#allocation1] sm:$0x3]   ;;  %s1126_s17 = smov 46  }
  0x1f   :  { %100 = vrot.lane.b32.xlu1 %v99_v12, %s1097_s18  ;;  %v179_v23 = vld [vmem:[#allocation1] sm:$0x3]   ;;  %s1127_s18 = smov 44  }
  0x20   :  { %v187_v24 = vld [vmem:[#allocation1] sm:$0x3]  }
  0x21   :  { %v195_v25 = vld [vmem:[#allocation1] sm:$0x3]  }
  0x22   :  { %108 = vrot.lane.b32.xlu0 %v107_v13, %s1098_s19  ;;  %v203_v26 = vld [vmem:[#allocation1] sm:$0x3]   ;;  %s1128_s19 = smov 42  }
  0x23   :  { %116 = vrot.lane.b32.xlu1 %v115_v14, %s1099_s20  ;;  %v211_v27 = vld [vmem:[#allocation1] sm:$0x3]   ;;  %s1129_s20 = smov 40  }
  0x24   :  { %v219_v28 = vld [vmem:[#allocation1] sm:$0x3]  }
  0x25   :  { %v227_v29 = vld [vmem:[#allocation1] sm:$0x3]  }
  0x26   :  { %124 = vrot.lane.b32.xlu0 %v123_v15, %s1100_s21  ;;  %v235_v30 = vld [vmem:[#allocation1] sm:$0x3]   ;;  %s1130_s21 = smov 38  }
  0x27   :  { %132 = vrot.lane.b32.xlu1 %v131_v16, %s1101_s22  ;;  %v243_v31 = vld [vmem:[#allocation1] sm:$0x3]   ;;  %s1131_s22 = smov 36  }
  0x28   :  { %v251_v32 = vld [vmem:[#allocation1] sm:$0x3]  }
  0x29   :  { %v259_v33 = vld [vmem:[#allocation1] sm:$0x3]  }
  0x2a   :  { %140 = vrot.lane.b32.xlu0 %v139_v18, %s1102_s23  ;;  %v267_v34 = vld [vmem:[#allocation1] sm:$0x3]   ;;  %s1132_s23 = smov 34  }
  0x2b   :  { %148 = vrot.lane.b32.xlu1 %v147_v19, %s1103_s24  ;;  %v275_v35 = vld [vmem:[#allocation1] sm:$0x3]   ;;  %s1133_s24 = smov 32  }
  0x2c   :  { %v283_v36 = vld [vmem:[#allocation1] sm:$0x3]  }
  0x2d   :  { %v291_v37 = vld [vmem:[#allocation1] sm:$0x3]  }
  0x2e   :  { %156 = vrot.lane.b32.xlu0 %v155_v20, %s1104_s25  ;;  %v299_v38 = vld [vmem:[#allocation1] sm:$0x3]   ;;  %s1134_s25 = smov 30  }
  0x2f   :  { %164 = vrot.lane.b32.xlu1 %v163_v21, %s1105_s26  ;;  %v307_v39 = vld [vmem:[#allocation1] sm:$0x3]   ;;  %s1135_s26 = smov 28  }
  0x30   :  { %v315_v40 = vld [vmem:[#allocation1] sm:$0x3]  }
  0x31   :  { %v323_v41 = vld [vmem:[#allocation1] sm:$0x3]  }
  0x32   :  { %172 = vrot.lane.b32.xlu0 %v171_v22, %s1106_s27  ;;  %v331_v42 = vld [vmem:[#allocation1] sm:$0x3]   ;;  %s1136_s27 = smov 26  }
  0x33   :  { %180 = vrot.lane.b32.xlu1 %v179_v23, %s1107_s28  ;;  %v339_v43 = vld [vmem:[#allocation1] sm:$0x3]   ;;  %s1137_s28 = smov 24  }
  0x34   :  { %v347_v44 = vld [vmem:[#allocation1] sm:$0x3]  }
  0x35   :  { %v355_v45 = vld [vmem:[#allocation1] sm:$0x3]  }
  0x36   :  { %188 = vrot.lane.b32.xlu0 %v187_v24, %s1108_s29  ;;  %v363_v46 = vld [vmem:[#allocation1] sm:$0x3]   ;;  %s1138_s29 = smov 22  }
  0x37   :  { %196 = vrot.lane.b32.xlu1 %v195_v25, %s1109_s30  ;;  %v371_v47 = vld [vmem:[#allocation1] sm:$0x3]   ;;  %s1139_s30 = smov 20  }
  0x38   :  { %v379_v48 = vld [vmem:[#allocation1] sm:$0x3]  }
  0x39   :  { %v387_v49 = vld [vmem:[#allocation1] sm:$0x3]  }
  0x3a   :  { %204 = vrot.lane.b32.xlu0 %v203_v26, %s1110_s2  ;;  %v395_v50 = vld [vmem:[#allocation1] sm:$0x3]   ;;  %s1140_s2 = smov 18  }
  0x3b   :  { %212 = vrot.lane.b32.xlu1 %v211_v27, %s1111_s3  ;;  %v403_v51 = vld [vmem:[#allocation1] sm:$0x3]   ;;  %s1141_s3 = smov 16  }
  0x3c   :  { %v411_v52 = vld [vmem:[#allocation1] sm:$0x3]  }
  0x3d   :  { %v419_v53 = vld [vmem:[#allocation1] sm:$0x3]  }
  0x3e   :  { %220 = vrot.lane.b32.xlu0 %v219_v28, %s1112_s4  ;;  %v427_v54 = vld [vmem:[#allocation1] sm:$0x3]   ;;  %s1142_s4 = smov 14  }
  0x3f   :  { %228 = vrot.lane.b32.xlu1 %v227_v29, %s1113_s5  ;;  %v435_v55 = vld [vmem:[#allocation1] sm:$0x3]   ;;  %s1143_s5 = smov 12  }
  0x40   :  { %v443_v56 = vld [vmem:[#allocation1] sm:$0x3]  }
  0x41   :  { %v451_v57 = vld [vmem:[#allocation1] sm:$0x3]  }
  0x42   :  { %236 = vrot.lane.b32.xlu0 %v235_v30, %s1114_s6  ;;  %v459_v58 = vld [vmem:[#allocation1] sm:$0x3]   ;;  %s1144_s6 = smov 10  }
  0x43   :  { %244 = vrot.lane.b32.xlu1 %v243_v31, %s1115_s7  ;;  %v467_v59 = vld [vmem:[#allocation1] sm:$0x3]   ;;  %s1145_s7 = smov 8  }
  0x44   :  { %v475_v60 = vld [vmem:[#allocation1] sm:$0x3]  }
  0x45   :  { %v483_v61 = vld [vmem:[#allocation1] sm:$0x3]  }
  0x46   :  { %252 = vrot.lane.b32.xlu0 %v251_v32, %s1116_s0  ;;  %v491_v0 = vld [vmem:[#allocation1] sm:$0x3]   ;;  %s1146_s0 = smov 6  }
  0x47   :  { %260 = vrot.lane.b32.xlu1 %v259_v33, %s1117_s8  ;;  %v499_v1 = vld [vmem:[#allocation1] sm:$0x3]   ;;  %s1147_s8 = smov 4  }
  0x48   :  { %v507_v4 = vld [vmem:[#allocation1] sm:$0x3]  }
  0x4a   :  { %268 = vrot.lane.b32.xlu0 %v267_v34, %s1118_s9 }
  0x4b   :  { %276 = vrot.lane.b32.xlu1 %v275_v35, %s1119_s10 }
  0x4e   :  { %284 = vrot.lane.b32.xlu0 %v283_v36, %s1120_s11 }
  0x4f   :  { %292 = vrot.lane.b32.xlu1 %v291_v37, %s1121_s12 }
  0x52   :  { %300 = vrot.lane.b32.xlu0 %v299_v38, %s1122_s13  ;;  %s1148_s13 = smov 2  }
  0x53   :  { %308 = vrot.lane.b32.xlu1 %v307_v39, %s1123_s14 }
  0x56   :  { %316 = vrot.lane.b32.xlu0 %v315_v40, %s1124_s15 }
  0x57   :  { %324 = vrot.lane.b32.xlu1 %v323_v41, %s1125_s16 }
  0x5a   :  { %332 = vrot.lane.b32.xlu0 %v331_v42, %s1126_s17 }
  0x5b   :  { %340 = vrot.lane.b32.xlu1 %v339_v43, %s1127_s18 }
  0x5e   :  { %348 = vrot.lane.b32.xlu0 %v347_v44, %s1128_s19 }
  0x5f   :  { %356 = vrot.lane.b32.xlu1 %v355_v45, %s1129_s20 }
  0x62   :  { %364 = vrot.lane.b32.xlu0 %v363_v46, %s1130_s21 }
  0x63   :  { %372 = vrot.lane.b32.xlu1 %v371_v47, %s1131_s22 }
  0x66   :  { %380 = vrot.lane.b32.xlu0 %v379_v48, %s1132_s23 }
  0x67   :  { %388 = vrot.lane.b32.xlu1 %v387_v49, %s1133_s24 }
  0x6a   :  { %396 = vrot.lane.b32.xlu0 %v395_v50, %s1134_s25 }
  0x6b   :  { %404 = vrot.lane.b32.xlu1 %v403_v51, %s1135_s26 }
  0x6e   :  { %412 = vrot.lane.b32.xlu0 %v411_v52, %s1136_s27 }
  0x6f   :  { %420 = vrot.lane.b32.xlu1 %v419_v53, %s1137_s28 }
  0x72   :  { %428 = vrot.lane.b32.xlu0 %v427_v54, %s1138_s29 }
  0x73   :  { %436 = vrot.lane.b32.xlu1 %v435_v55, %s1139_s30 }
  0x76   :  { %444 = vrot.lane.b32.xlu0 %v443_v56, %s1140_s2 }
  0x77   :  { %452 = vrot.lane.b32.xlu1 %v451_v57, %s1141_s3 }
  0x7a   :  { %460 = vrot.lane.b32.xlu0 %v459_v58, %s1142_s4 }
  0x7b   :  { %468 = vrot.lane.b32.xlu1 %v467_v59, %s1143_s5 }
  0x7c   :  { %v13_v62 = vpop.permute.xlu0 %12  }
  0x7d   :  { %v29_v63 = vpop.permute.xlu1 %28   ;;  %16 = vst.msk [vmem:[#allocation0 + $0x1] sm:$0x1] %vm7_vm0, %v13_v62   ;;  %18 = vst.msk [vmem:[#allocation0 + $0x100] sm:$0x2] %vm7_vm0, %v13_v62  }
  0x7e   :  { %32 = vst.msk [vmem:[#allocation0 + $0x9] sm:$0x1] %vm7_vm0, %v29_v63   ;;  %34 = vst.msk [vmem:[#allocation0 + $0x108] sm:$0x2] %vm7_vm0, %v29_v63   ;;  %476 = vrot.lane.b32.xlu0 %v475_v60, %s1144_s6 }
  0x7f   :  { %484 = vrot.lane.b32.xlu1 %v483_v61, %s1145_s7 }
  0x80   :  { %v21_v2 = vpop.permute.xlu0 %20  }
  0x81   :  { %v37_v3 = vpop.permute.xlu1 %36   ;;  %24 = vst.msk [vmem:[#allocation0 + $0x8] sm:$0x1] %vm7_vm0, %v21_v2   ;;  %26 = vst.msk [vmem:[#allocation0 + $0x107] sm:$0x2] %vm7_vm0, %v21_v2  }
  0x82   :  { %40 = vst.msk [vmem:[#allocation0 + $0x10] sm:$0x1] %vm7_vm0, %v37_v3   ;;  %42 = vst.msk [vmem:[#allocation0 + $0x10f] sm:$0x2] %vm7_vm0, %v37_v3   ;;  %492 = vrot.lane.b32.xlu0 %v491_v0, %s1146_s0 }
  0x83   :  { %500 = vrot.lane.b32.xlu1 %v499_v1, %s1147_s8 }
  0x84   :  { %v518_v5 = vld [vmem:[#allocation0] sm:$0x3]  ;;  %v45_v7 = vpop.permute.xlu0 %44  }
  0x85   :  { %v707_v6 = vld [vmem:[#allocation0 + $0x100] sm:$0x3]  ;;  %v53_v8 = vpop.permute.xlu1 %52   ;;  %520 = vst [vmem:[%s1483_s1] sm:$0x3] %v518_v5  ;;  %48 = vst.msk [vmem:[#allocation0 + $0x11] sm:$0x1] %vm7_vm0, %v45_v7  }
  0x86   :  { %991 = vst [vmem:[%s1483_s1 + $0x40] sm:$0x3] %v707_v6  ;;  %50 = vst.msk [vmem:[#allocation0 + $0x110] sm:$0x2] %vm7_vm0, %v45_v7   ;;  %508 = vrot.lane.b32.xlu0 %v507_v4, %s1148_s13 }
  0x87   :  { %56 = vst.msk [vmem:[#allocation0 + $0x18] sm:$0x1] %vm7_vm0, %v53_v8   ;;  %58 = vst.msk [vmem:[#allocation0 + $0x117] sm:$0x2] %vm7_vm0, %v53_v8  }
  0x88   :  { %v522_v9 = vld [vmem:[#allocation0 + $0x8] sm:$0x3]  ;;  %v61_v11 = vpop.permute.xlu0 %60  }
  0x89   :  { %v713_v10 = vld [vmem:[#allocation0 + $0x108] sm:$0x3]  ;;  %v69_v12 = vpop.permute.xlu1 %68   ;;  %960 = vst [vmem:[%s1483_s1 + $0x2] sm:$0x3] %v522_v9  ;;  %64 = vst.msk [vmem:[#allocation0 + $0x19] sm:$0x1] %vm7_vm0, %v61_v11  }
  0x8a   :  { %992 = vst [vmem:[%s1483_s1 + $0x42] sm:$0x3] %v713_v10  ;;  %66 = vst.msk [vmem:[#allocation0 + $0x118] sm:$0x2] %vm7_vm0, %v61_v11  }
  0x8b   :  { %72 = vst.msk [vmem:[#allocation0 + $0x20] sm:$0x1] %vm7_vm0, %v69_v12   ;;  %74 = vst.msk [vmem:[#allocation0 + $0x11f] sm:$0x2] %vm7_vm0, %v69_v12  }
  0x8c   :  { %v527_v14 = vld [vmem:[#allocation0 + $0x10] sm:$0x3]  ;;  %v77_v15 = vpop.permute.xlu0 %76  }
  0x8d   :  { %v719_v13 = vld [vmem:[#allocation0 + $0x110] sm:$0x3]  ;;  %v85_v16 = vpop.permute.xlu1 %84   ;;  %961 = vst [vmem:[%s1483_s1 + $0x4] sm:$0x3] %v527_v14  ;;  %80 = vst.msk [vmem:[#allocation0 + $0x21] sm:$0x1] %vm7_vm0, %v77_v15  }
  0x8e   :  { %993 = vst [vmem:[%s1483_s1 + $0x44] sm:$0x3] %v719_v13  ;;  %82 = vst.msk [vmem:[#allocation0 + $0x120] sm:$0x2] %vm7_vm0, %v77_v15  }
  0x8f   :  { %88 = vst.msk [vmem:[#allocation0 + $0x28] sm:$0x1] %vm7_vm0, %v85_v16   ;;  %90 = vst.msk [vmem:[#allocation0 + $0x127] sm:$0x2] %vm7_vm0, %v85_v16  }
  0x90   :  { %v533_v17 = vld [vmem:[#allocation0 + $0x18] sm:$0x3]  ;;  %v93_v19 = vpop.permute.xlu0 %92  }
  0x91   :  { %v725_v18 = vld [vmem:[#allocation0 + $0x118] sm:$0x3]  ;;  %v101_v20 = vpop.permute.xlu1 %100   ;;  %962 = vst [vmem:[%s1483_s1 + $0x6] sm:$0x3] %v533_v17  ;;  %96 = vst.msk [vmem:[#allocation0 + $0x29] sm:$0x1] %vm7_vm0, %v93_v19  }
  0x92   :  { %994 = vst [vmem:[%s1483_s1 + $0x46] sm:$0x3] %v725_v18  ;;  %98 = vst.msk [vmem:[#allocation0 + $0x128] sm:$0x2] %vm7_vm0, %v93_v19  }
  0x93   :  { %104 = vst.msk [vmem:[#allocation0 + $0x30] sm:$0x1] %vm7_vm0, %v101_v20   ;;  %106 = vst.msk [vmem:[#allocation0 + $0x12f] sm:$0x2] %vm7_vm0, %v101_v20  }
  0x94   :  { %v539_v21 = vld [vmem:[#allocation0 + $0x20] sm:$0x3]  ;;  %v109_v23 = vpop.permute.xlu0 %108  }
  0x95   :  { %v731_v22 = vld [vmem:[#allocation0 + $0x120] sm:$0x3]  ;;  %v117_v24 = vpop.permute.xlu1 %116   ;;  %963 = vst [vmem:[%s1483_s1 + $0x8] sm:$0x3] %v539_v21  ;;  %112 = vst.msk [vmem:[#allocation0 + $0x31] sm:$0x1] %vm7_vm0, %v109_v23  }
  0x96   :  { %995 = vst [vmem:[%s1483_s1 + $0x48] sm:$0x3] %v731_v22  ;;  %114 = vst.msk [vmem:[#allocation0 + $0x130] sm:$0x2] %vm7_vm0, %v109_v23  }
  0x97   :  { %120 = vst.msk [vmem:[#allocation0 + $0x38] sm:$0x1] %vm7_vm0, %v117_v24   ;;  %122 = vst.msk [vmem:[#allocation0 + $0x137] sm:$0x2] %vm7_vm0, %v117_v24  }
  0x98   :  { %v545_v26 = vld [vmem:[#allocation0 + $0x28] sm:$0x3]  ;;  %v125_v27 = vpop.permute.xlu0 %124  }
  0x99   :  { %v737_v25 = vld [vmem:[#allocation0 + $0x128] sm:$0x3]  ;;  %v133_v28 = vpop.permute.xlu1 %132   ;;  %964 = vst [vmem:[%s1483_s1 + $0xa] sm:$0x3] %v545_v26  ;;  %128 = vst.msk [vmem:[#allocation0 + $0x39] sm:$0x1] %vm7_vm0, %v125_v27  }
  0x9a   :  { %996 = vst [vmem:[%s1483_s1 + $0x4a] sm:$0x3] %v737_v25  ;;  %130 = vst.msk [vmem:[#allocation0 + $0x138] sm:$0x2] %vm7_vm0, %v125_v27  }
  0x9b   :  { %136 = vst.msk [vmem:[#allocation0 + $0x40] sm:$0x1] %vm7_vm0, %v133_v28   ;;  %138 = vst.msk [vmem:[#allocation0 + $0x13f] sm:$0x2] %vm7_vm0, %v133_v28  }
  0x9c   :  { %v551_v29 = vld [vmem:[#allocation0 + $0x30] sm:$0x3]  ;;  %v141_v31 = vpop.permute.xlu0 %140  }
  0x9d   :  { %v743_v30 = vld [vmem:[#allocation0 + $0x130] sm:$0x3]  ;;  %v149_v32 = vpop.permute.xlu1 %148   ;;  %965 = vst [vmem:[%s1483_s1 + $0xc] sm:$0x3] %v551_v29  ;;  %144 = vst.msk [vmem:[#allocation0 + $0x41] sm:$0x1] %vm7_vm0, %v141_v31  }
  0x9e   :  { %997 = vst [vmem:[%s1483_s1 + $0x4c] sm:$0x3] %v743_v30  ;;  %146 = vst.msk [vmem:[#allocation0 + $0x140] sm:$0x2] %vm7_vm0, %v141_v31  }
  0x9f   :  { %152 = vst.msk [vmem:[#allocation0 + $0x48] sm:$0x1] %vm7_vm0, %v149_v32   ;;  %154 = vst.msk [vmem:[#allocation0 + $0x147] sm:$0x2] %vm7_vm0, %v149_v32  }
  0xa0   :  { %v557_v33 = vld [vmem:[#allocation0 + $0x38] sm:$0x3]  ;;  %v157_v35 = vpop.permute.xlu0 %156  }
  0xa1   :  { %v749_v34 = vld [vmem:[#allocation0 + $0x138] sm:$0x3]  ;;  %v165_v36 = vpop.permute.xlu1 %164   ;;  %966 = vst [vmem:[%s1483_s1 + $0xe] sm:$0x3] %v557_v33  ;;  %160 = vst.msk [vmem:[#allocation0 + $0x49] sm:$0x1] %vm7_vm0, %v157_v35  }
  0xa2   :  { %998 = vst [vmem:[%s1483_s1 + $0x4e] sm:$0x3] %v749_v34  ;;  %162 = vst.msk [vmem:[#allocation0 + $0x148] sm:$0x2] %vm7_vm0, %v157_v35  }
  0xa3   :  { %168 = vst.msk [vmem:[#allocation0 + $0x50] sm:$0x1] %vm7_vm0, %v165_v36   ;;  %170 = vst.msk [vmem:[#allocation0 + $0x14f] sm:$0x2] %vm7_vm0, %v165_v36  }
  0xa4   :  { %v563_v37 = vld [vmem:[#allocation0 + $0x40] sm:$0x3]  ;;  %v173_v39 = vpop.permute.xlu0 %172  }
  0xa5   :  { %v755_v38 = vld [vmem:[#allocation0 + $0x140] sm:$0x3]  ;;  %v181_v40 = vpop.permute.xlu1 %180   ;;  %967 = vst [vmem:[%s1483_s1 + $0x10] sm:$0x3] %v563_v37  ;;  %176 = vst.msk [vmem:[#allocation0 + $0x51] sm:$0x1] %vm7_vm0, %v173_v39  }
  0xa6   :  { %999 = vst [vmem:[%s1483_s1 + $0x50] sm:$0x3] %v755_v38  ;;  %178 = vst.msk [vmem:[#allocation0 + $0x150] sm:$0x2] %vm7_vm0, %v173_v39  }
  0xa7   :  { %184 = vst.msk [vmem:[#allocation0 + $0x58] sm:$0x1] %vm7_vm0, %v181_v40   ;;  %186 = vst.msk [vmem:[#allocation0 + $0x157] sm:$0x2] %vm7_vm0, %v181_v40  }
  0xa8   :  { %v569_v41 = vld [vmem:[#allocation0 + $0x48] sm:$0x3]  ;;  %v189_v43 = vpop.permute.xlu0 %188  }
  0xa9   :  { %v761_v42 = vld [vmem:[#allocation0 + $0x148] sm:$0x3]  ;;  %v197_v44 = vpop.permute.xlu1 %196   ;;  %968 = vst [vmem:[%s1483_s1 + $0x12] sm:$0x3] %v569_v41  ;;  %192 = vst.msk [vmem:[#allocation0 + $0x59] sm:$0x1] %vm7_vm0, %v189_v43  }
  0xaa   :  { %1000 = vst [vmem:[%s1483_s1 + $0x52] sm:$0x3] %v761_v42  ;;  %194 = vst.msk [vmem:[#allocation0 + $0x158] sm:$0x2] %vm7_vm0, %v189_v43  }
  0xab   :  { %200 = vst.msk [vmem:[#allocation0 + $0x60] sm:$0x1] %vm7_vm0, %v197_v44   ;;  %202 = vst.msk [vmem:[#allocation0 + $0x15f] sm:$0x2] %vm7_vm0, %v197_v44  }
  0xac   :  { %v575_v45 = vld [vmem:[#allocation0 + $0x50] sm:$0x3]  ;;  %v205_v47 = vpop.permute.xlu0 %204  }
  0xad   :  { %v767_v46 = vld [vmem:[#allocation0 + $0x150] sm:$0x3]  ;;  %v213_v48 = vpop.permute.xlu1 %212   ;;  %969 = vst [vmem:[%s1483_s1 + $0x14] sm:$0x3] %v575_v45  ;;  %208 = vst.msk [vmem:[#allocation0 + $0x61] sm:$0x1] %vm7_vm0, %v205_v47  }
  0xae   :  { %1001 = vst [vmem:[%s1483_s1 + $0x54] sm:$0x3] %v767_v46  ;;  %210 = vst.msk [vmem:[#allocation0 + $0x160] sm:$0x2] %vm7_vm0, %v205_v47  }
  0xaf   :  { %216 = vst.msk [vmem:[#allocation0 + $0x68] sm:$0x1] %vm7_vm0, %v213_v48   ;;  %218 = vst.msk [vmem:[#allocation0 + $0x167] sm:$0x2] %vm7_vm0, %v213_v48  }
  0xb0   :  { %v581_v49 = vld [vmem:[#allocation0 + $0x58] sm:$0x3]  ;;  %v221_v51 = vpop.permute.xlu0 %220  }
  0xb1   :  { %v773_v50 = vld [vmem:[#allocation0 + $0x158] sm:$0x3]  ;;  %v229_v52 = vpop.permute.xlu1 %228   ;;  %970 = vst [vmem:[%s1483_s1 + $0x16] sm:$0x3] %v581_v49  ;;  %224 = vst.msk [vmem:[#allocation0 + $0x69] sm:$0x1] %vm7_vm0, %v221_v51  }
  0xb2   :  { %1002 = vst [vmem:[%s1483_s1 + $0x56] sm:$0x3] %v773_v50  ;;  %226 = vst.msk [vmem:[#allocation0 + $0x168] sm:$0x2] %vm7_vm0, %v221_v51  }
  0xb3   :  { %232 = vst.msk [vmem:[#allocation0 + $0x70] sm:$0x1] %vm7_vm0, %v229_v52   ;;  %234 = vst.msk [vmem:[#allocation0 + $0x16f] sm:$0x2] %vm7_vm0, %v229_v52  }
  0xb4   :  { %v587_v53 = vld [vmem:[#allocation0 + $0x60] sm:$0x3]  ;;  %v237_v55 = vpop.permute.xlu0 %236  }
  0xb5   :  { %v779_v54 = vld [vmem:[#allocation0 + $0x160] sm:$0x3]  ;;  %v245_v56 = vpop.permute.xlu1 %244   ;;  %971 = vst [vmem:[%s1483_s1 + $0x18] sm:$0x3] %v587_v53  ;;  %240 = vst.msk [vmem:[#allocation0 + $0x71] sm:$0x1] %vm7_vm0, %v237_v55  }
  0xb6   :  { %1003 = vst [vmem:[%s1483_s1 + $0x58] sm:$0x3] %v779_v54  ;;  %242 = vst.msk [vmem:[#allocation0 + $0x170] sm:$0x2] %vm7_vm0, %v237_v55  }
  0xb7   :  { %248 = vst.msk [vmem:[#allocation0 + $0x78] sm:$0x1] %vm7_vm0, %v245_v56   ;;  %250 = vst.msk [vmem:[#allocation0 + $0x177] sm:$0x2] %vm7_vm0, %v245_v56  }
  0xb8   :  { %v593_v57 = vld [vmem:[#allocation0 + $0x68] sm:$0x3]  ;;  %v253_v59 = vpop.permute.xlu0 %252  }
  0xb9   :  { %v785_v58 = vld [vmem:[#allocation0 + $0x168] sm:$0x3]  ;;  %v261_v60 = vpop.permute.xlu1 %260   ;;  %972 = vst [vmem:[%s1483_s1 + $0x1a] sm:$0x3] %v593_v57  ;;  %256 = vst.msk [vmem:[#allocation0 + $0x79] sm:$0x1] %vm7_vm0, %v253_v59  }
  0xba   :  { %1004 = vst [vmem:[%s1483_s1 + $0x5a] sm:$0x3] %v785_v58  ;;  %258 = vst.msk [vmem:[#allocation0 + $0x178] sm:$0x2] %vm7_vm0, %v253_v59  }
  0xbb   :  { %264 = vst.msk [vmem:[#allocation0 + $0x80] sm:$0x1] %vm7_vm0, %v261_v60   ;;  %266 = vst.msk [vmem:[#allocation0 + $0x17f] sm:$0x2] %vm7_vm0, %v261_v60  }
  0xbc   :  { %v599_v62 = vld [vmem:[#allocation0 + $0x70] sm:$0x3]  ;;  %v269_v63 = vpop.permute.xlu0 %268  }
  0xbd   :  { %v791_v61 = vld [vmem:[#allocation0 + $0x170] sm:$0x3]  ;;  %v277_v0 = vpop.permute.xlu1 %276   ;;  %973 = vst [vmem:[%s1483_s1 + $0x1c] sm:$0x3] %v599_v62  ;;  %272 = vst.msk [vmem:[#allocation0 + $0x81] sm:$0x1] %vm7_vm0, %v269_v63  }
  0xbe   :  { %1005 = vst [vmem:[%s1483_s1 + $0x5c] sm:$0x3] %v791_v61  ;;  %274 = vst.msk [vmem:[#allocation0 + $0x180] sm:$0x2] %vm7_vm0, %v269_v63  }
  0xbf   :  { %280 = vst.msk [vmem:[#allocation0 + $0x88] sm:$0x1] %vm7_vm0, %v277_v0   ;;  %282 = vst.msk [vmem:[#allocation0 + $0x187] sm:$0x2] %vm7_vm0, %v277_v0  }
  0xc0   :  { %v605_v1 = vld [vmem:[#allocation0 + $0x78] sm:$0x3]  ;;  %v285_v3 = vpop.permute.xlu0 %284  }
  0xc1   :  { %v797_v2 = vld [vmem:[#allocation0 + $0x178] sm:$0x3]  ;;  %v293_v4 = vpop.permute.xlu1 %292   ;;  %974 = vst [vmem:[%s1483_s1 + $0x1e] sm:$0x3] %v605_v1  ;;  %288 = vst.msk [vmem:[#allocation0 + $0x89] sm:$0x1] %vm7_vm0, %v285_v3  }
  0xc2   :  { %1006 = vst [vmem:[%s1483_s1 + $0x5e] sm:$0x3] %v797_v2  ;;  %290 = vst.msk [vmem:[#allocation0 + $0x188] sm:$0x2] %vm7_vm0, %v285_v3  }
  0xc3   :  { %296 = vst.msk [vmem:[#allocation0 + $0x90] sm:$0x1] %vm7_vm0, %v293_v4   ;;  %298 = vst.msk [vmem:[#allocation0 + $0x18f] sm:$0x2] %vm7_vm0, %v293_v4  }
  0xc4   :  { %v611_v5 = vld [vmem:[#allocation0 + $0x80] sm:$0x3]  ;;  %v301_v7 = vpop.permute.xlu0 %300  }
  0xc5   :  { %v803_v6 = vld [vmem:[#allocation0 + $0x180] sm:$0x3]  ;;  %v309_v8 = vpop.permute.xlu1 %308   ;;  %975 = vst [vmem:[%s1483_s1 + $0x20] sm:$0x3] %v611_v5  ;;  %304 = vst.msk [vmem:[#allocation0 + $0x91] sm:$0x1] %vm7_vm0, %v301_v7  }
  0xc6   :  { %1007 = vst [vmem:[%s1483_s1 + $0x60] sm:$0x3] %v803_v6  ;;  %306 = vst.msk [vmem:[#allocation0 + $0x190] sm:$0x2] %vm7_vm0, %v301_v7  }
  0xc7   :  { %312 = vst.msk [vmem:[#allocation0 + $0x98] sm:$0x1] %vm7_vm0, %v309_v8   ;;  %314 = vst.msk [vmem:[#allocation0 + $0x197] sm:$0x2] %vm7_vm0, %v309_v8  }
  0xc8   :  { %v617_v9 = vld [vmem:[#allocation0 + $0x88] sm:$0x3]  ;;  %v317_v11 = vpop.permute.xlu0 %316  }
  0xc9   :  { %v809_v10 = vld [vmem:[#allocation0 + $0x188] sm:$0x3]  ;;  %v325_v12 = vpop.permute.xlu1 %324   ;;  %976 = vst [vmem:[%s1483_s1 + $0x22] sm:$0x3] %v617_v9  ;;  %320 = vst.msk [vmem:[#allocation0 + $0x99] sm:$0x1] %vm7_vm0, %v317_v11  }
  0xca   :  { %1008 = vst [vmem:[%s1483_s1 + $0x62] sm:$0x3] %v809_v10  ;;  %322 = vst.msk [vmem:[#allocation0 + $0x198] sm:$0x2] %vm7_vm0, %v317_v11  }
  0xcb   :  { %328 = vst.msk [vmem:[#allocation0 + $0xa0] sm:$0x1] %vm7_vm0, %v325_v12   ;;  %330 = vst.msk [vmem:[#allocation0 + $0x19f] sm:$0x2] %vm7_vm0, %v325_v12  }
  0xcc   :  { %v623_v13 = vld [vmem:[#allocation0 + $0x90] sm:$0x3]  ;;  %v333_v15 = vpop.permute.xlu0 %332  }
  0xcd   :  { %v815_v14 = vld [vmem:[#allocation0 + $0x190] sm:$0x3]  ;;  %v341_v16 = vpop.permute.xlu1 %340   ;;  %977 = vst [vmem:[%s1483_s1 + $0x24] sm:$0x3] %v623_v13  ;;  %336 = vst.msk [vmem:[#allocation0 + $0xa1] sm:$0x1] %vm7_vm0, %v333_v15  }
  0xce   :  { %1009 = vst [vmem:[%s1483_s1 + $0x64] sm:$0x3] %v815_v14  ;;  %338 = vst.msk [vmem:[#allocation0 + $0x1a0] sm:$0x2] %vm7_vm0, %v333_v15  }
  0xcf   :  { %344 = vst.msk [vmem:[#allocation0 + $0xa8] sm:$0x1] %vm7_vm0, %v341_v16   ;;  %346 = vst.msk [vmem:[#allocation0 + $0x1a7] sm:$0x2] %vm7_vm0, %v341_v16  }
  0xd0   :  { %v629_v17 = vld [vmem:[#allocation0 + $0x98] sm:$0x3]  ;;  %v349_v19 = vpop.permute.xlu0 %348  }
  0xd1   :  { %v821_v18 = vld [vmem:[#allocation0 + $0x198] sm:$0x3]  ;;  %v357_v20 = vpop.permute.xlu1 %356   ;;  %978 = vst [vmem:[%s1483_s1 + $0x26] sm:$0x3] %v629_v17  ;;  %352 = vst.msk [vmem:[#allocation0 + $0xa9] sm:$0x1] %vm7_vm0, %v349_v19  }
  0xd2   :  { %1010 = vst [vmem:[%s1483_s1 + $0x66] sm:$0x3] %v821_v18  ;;  %354 = vst.msk [vmem:[#allocation0 + $0x1a8] sm:$0x2] %vm7_vm0, %v349_v19  }
  0xd3   :  { %360 = vst.msk [vmem:[#allocation0 + $0xb0] sm:$0x1] %vm7_vm0, %v357_v20   ;;  %362 = vst.msk [vmem:[#allocation0 + $0x1af] sm:$0x2] %vm7_vm0, %v357_v20  }
  0xd4   :  { %v635_v22 = vld [vmem:[#allocation0 + $0xa0] sm:$0x3]  ;;  %v365_v23 = vpop.permute.xlu0 %364  }
  0xd5   :  { %v827_v21 = vld [vmem:[#allocation0 + $0x1a0] sm:$0x3]  ;;  %v373_v24 = vpop.permute.xlu1 %372   ;;  %979 = vst [vmem:[%s1483_s1 + $0x28] sm:$0x3] %v635_v22  ;;  %368 = vst.msk [vmem:[#allocation0 + $0xb1] sm:$0x1] %vm7_vm0, %v365_v23  }
  0xd6   :  { %1011 = vst [vmem:[%s1483_s1 + $0x68] sm:$0x3] %v827_v21  ;;  %370 = vst.msk [vmem:[#allocation0 + $0x1b0] sm:$0x2] %vm7_vm0, %v365_v23  }
  0xd7   :  { %376 = vst.msk [vmem:[#allocation0 + $0xb8] sm:$0x1] %vm7_vm0, %v373_v24   ;;  %378 = vst.msk [vmem:[#allocation0 + $0x1b7] sm:$0x2] %vm7_vm0, %v373_v24  }
  0xd8   :  { %v641_v25 = vld [vmem:[#allocation0 + $0xa8] sm:$0x3]  ;;  %v381_v27 = vpop.permute.xlu0 %380  }
  0xd9   :  { %v833_v26 = vld [vmem:[#allocation0 + $0x1a8] sm:$0x3]  ;;  %v389_v28 = vpop.permute.xlu1 %388   ;;  %980 = vst [vmem:[%s1483_s1 + $0x2a] sm:$0x3] %v641_v25  ;;  %384 = vst.msk [vmem:[#allocation0 + $0xb9] sm:$0x1] %vm7_vm0, %v381_v27  }
  0xda   :  { %1012 = vst [vmem:[%s1483_s1 + $0x6a] sm:$0x3] %v833_v26  ;;  %386 = vst.msk [vmem:[#allocation0 + $0x1b8] sm:$0x2] %vm7_vm0, %v381_v27  }
  0xdb   :  { %392 = vst.msk [vmem:[#allocation0 + $0xc0] sm:$0x1] %vm7_vm0, %v389_v28   ;;  %394 = vst.msk [vmem:[#allocation0 + $0x1bf] sm:$0x2] %vm7_vm0, %v389_v28  }
  0xdc   :  { %v647_v29 = vld [vmem:[#allocation0 + $0xb0] sm:$0x3]  ;;  %v397_v31 = vpop.permute.xlu0 %396  }
  0xdd   :  { %v839_v30 = vld [vmem:[#allocation0 + $0x1b0] sm:$0x3]  ;;  %v405_v32 = vpop.permute.xlu1 %404   ;;  %981 = vst [vmem:[%s1483_s1 + $0x2c] sm:$0x3] %v647_v29  ;;  %400 = vst.msk [vmem:[#allocation0 + $0xc1] sm:$0x1] %vm7_vm0, %v397_v31  }
  0xde   :  { %1013 = vst [vmem:[%s1483_s1 + $0x6c] sm:$0x3] %v839_v30  ;;  %402 = vst.msk [vmem:[#allocation0 + $0x1c0] sm:$0x2] %vm7_vm0, %v397_v31  }
  0xdf   :  { %408 = vst.msk [vmem:[#allocation0 + $0xc8] sm:$0x1] %vm7_vm0, %v405_v32   ;;  %410 = vst.msk [vmem:[#allocation0 + $0x1c7] sm:$0x2] %vm7_vm0, %v405_v32  }
  0xe0   :  { %v653_v33 = vld [vmem:[#allocation0 + $0xb8] sm:$0x3]  ;;  %v413_v35 = vpop.permute.xlu0 %412  }
  0xe1   :  { %v845_v34 = vld [vmem:[#allocation0 + $0x1b8] sm:$0x3]  ;;  %v421_v36 = vpop.permute.xlu1 %420   ;;  %982 = vst [vmem:[%s1483_s1 + $0x2e] sm:$0x3] %v653_v33  ;;  %416 = vst.msk [vmem:[#allocation0 + $0xc9] sm:$0x1] %vm7_vm0, %v413_v35  }
  0xe2   :  { %1014 = vst [vmem:[%s1483_s1 + $0x6e] sm:$0x3] %v845_v34  ;;  %418 = vst.msk [vmem:[#allocation0 + $0x1c8] sm:$0x2] %vm7_vm0, %v413_v35  }
  0xe3   :  { %424 = vst.msk [vmem:[#allocation0 + $0xd0] sm:$0x1] %vm7_vm0, %v421_v36   ;;  %426 = vst.msk [vmem:[#allocation0 + $0x1cf] sm:$0x2] %vm7_vm0, %v421_v36  }
  0xe4   :  { %v659_v37 = vld [vmem:[#allocation0 + $0xc0] sm:$0x3]  ;;  %v429_v39 = vpop.permute.xlu0 %428  }
  0xe5   :  { %v851_v38 = vld [vmem:[#allocation0 + $0x1c0] sm:$0x3]  ;;  %v437_v40 = vpop.permute.xlu1 %436   ;;  %983 = vst [vmem:[%s1483_s1 + $0x30] sm:$0x3] %v659_v37  ;;  %432 = vst.msk [vmem:[#allocation0 + $0xd1] sm:$0x1] %vm7_vm0, %v429_v39  }
  0xe6   :  { %1015 = vst [vmem:[%s1483_s1 + $0x70] sm:$0x3] %v851_v38  ;;  %434 = vst.msk [vmem:[#allocation0 + $0x1d0] sm:$0x2] %vm7_vm0, %v429_v39  }
  0xe7   :  { %440 = vst.msk [vmem:[#allocation0 + $0xd8] sm:$0x1] %vm7_vm0, %v437_v40   ;;  %442 = vst.msk [vmem:[#allocation0 + $0x1d7] sm:$0x2] %vm7_vm0, %v437_v40  }
  0xe8   :  { %v665_v41 = vld [vmem:[#allocation0 + $0xc8] sm:$0x3]  ;;  %v445_v43 = vpop.permute.xlu0 %444  }
  0xe9   :  { %v857_v42 = vld [vmem:[#allocation0 + $0x1c8] sm:$0x3]  ;;  %v453_v44 = vpop.permute.xlu1 %452   ;;  %984 = vst [vmem:[%s1483_s1 + $0x32] sm:$0x3] %v665_v41  ;;  %448 = vst.msk [vmem:[#allocation0 + $0xd9] sm:$0x1] %vm7_vm0, %v445_v43  }
  0xea   :  { %1016 = vst [vmem:[%s1483_s1 + $0x72] sm:$0x3] %v857_v42  ;;  %450 = vst.msk [vmem:[#allocation0 + $0x1d8] sm:$0x2] %vm7_vm0, %v445_v43  }
  0xeb   :  { %456 = vst.msk [vmem:[#allocation0 + $0xe0] sm:$0x1] %vm7_vm0, %v453_v44   ;;  %458 = vst.msk [vmem:[#allocation0 + $0x1df] sm:$0x2] %vm7_vm0, %v453_v44  }
  0xec   :  { %v671_v45 = vld [vmem:[#allocation0 + $0xd0] sm:$0x3]  ;;  %v461_v47 = vpop.permute.xlu0 %460  }
  0xed   :  { %v863_v46 = vld [vmem:[#allocation0 + $0x1d0] sm:$0x3]  ;;  %v469_v48 = vpop.permute.xlu1 %468   ;;  %985 = vst [vmem:[%s1483_s1 + $0x34] sm:$0x3] %v671_v45  ;;  %464 = vst.msk [vmem:[#allocation0 + $0xe1] sm:$0x1] %vm7_vm0, %v461_v47  }
  0xee   :  { %1017 = vst [vmem:[%s1483_s1 + $0x74] sm:$0x3] %v863_v46  ;;  %466 = vst.msk [vmem:[#allocation0 + $0x1e0] sm:$0x2] %vm7_vm0, %v461_v47  }
  0xef   :  { %472 = vst.msk [vmem:[#allocation0 + $0xe8] sm:$0x1] %vm7_vm0, %v469_v48   ;;  %474 = vst.msk [vmem:[#allocation0 + $0x1e7] sm:$0x2] %vm7_vm0, %v469_v48  }
  0xf0   :  { %v677_v49 = vld [vmem:[#allocation0 + $0xd8] sm:$0x3]  ;;  %v477_v51 = vpop.permute.xlu0 %476  }
  0xf1   :  { %v869_v50 = vld [vmem:[#allocation0 + $0x1d8] sm:$0x3]  ;;  %v485_v52 = vpop.permute.xlu1 %484   ;;  %986 = vst [vmem:[%s1483_s1 + $0x36] sm:$0x3] %v677_v49  ;;  %480 = vst.msk [vmem:[#allocation0 + $0xe9] sm:$0x1] %vm7_vm0, %v477_v51  }
  0xf2   :  { %1018 = vst [vmem:[%s1483_s1 + $0x76] sm:$0x3] %v869_v50  ;;  %482 = vst.msk [vmem:[#allocation0 + $0x1e8] sm:$0x2] %vm7_vm0, %v477_v51  }
  0xf3   :  { %488 = vst.msk [vmem:[#allocation0 + $0xf0] sm:$0x1] %vm7_vm0, %v485_v52   ;;  %490 = vst.msk [vmem:[#allocation0 + $0x1ef] sm:$0x2] %vm7_vm0, %v485_v52  }
  0xf4   :  { %v683_v53 = vld [vmem:[#allocation0 + $0xe0] sm:$0x3]  ;;  %v493_v55 = vpop.permute.xlu0 %492  }
  0xf5   :  { %v875_v54 = vld [vmem:[#allocation0 + $0x1e0] sm:$0x3]  ;;  %v501_v56 = vpop.permute.xlu1 %500   ;;  %987 = vst [vmem:[%s1483_s1 + $0x38] sm:$0x3] %v683_v53  ;;  %496 = vst.msk [vmem:[#allocation0 + $0xf1] sm:$0x1] %vm7_vm0, %v493_v55  }
  0xf6   :  { %1019 = vst [vmem:[%s1483_s1 + $0x78] sm:$0x3] %v875_v54  ;;  %498 = vst.msk [vmem:[#allocation0 + $0x1f0] sm:$0x2] %vm7_vm0, %v493_v55  }
  0xf7   :  { %504 = vst.msk [vmem:[#allocation0 + $0xf8] sm:$0x1] %vm7_vm0, %v501_v56   ;;  %506 = vst.msk [vmem:[#allocation0 + $0x1f7] sm:$0x2] %vm7_vm0, %v501_v56  }
  0xf8   :  { %v689_v57 = vld [vmem:[#allocation0 + $0xe8] sm:$0x3]  ;;  %v509_v59 = vpop.permute.xlu0 %508  }
  0xf9   :  { %v881_v58 = vld [vmem:[#allocation0 + $0x1e8] sm:$0x3]  ;;  %988 = vst [vmem:[%s1483_s1 + $0x3a] sm:$0x3] %v689_v57  ;;  %512 = vst.msk [vmem:[#allocation0 + $0xf9] sm:$0x1] %vm7_vm0, %v509_v59  }
  0xfa   :  { %1020 = vst [vmem:[%s1483_s1 + $0x7a] sm:$0x3] %v881_v58  ;;  %514 = vst.msk [vmem:[#allocation0 + $0x1f8] sm:$0x2] %vm7_vm0, %v509_v59  }
  0xfc   :  { %v695_v60 = vld [vmem:[#allocation0 + $0xf0] sm:$0x3] }
  0xfd   :  { %v887_v61 = vld [vmem:[#allocation0 + $0x1f0] sm:$0x3]  ;;  %989 = vst [vmem:[%s1483_s1 + $0x3c] sm:$0x3] %v695_v60 }
  0xfe   :  { %1021 = vst [vmem:[%s1483_s1 + $0x7c] sm:$0x3] %v887_v61 }
 0x100   :  { %v701_v62 = vld [vmem:[#allocation0 + $0xf8] sm:$0x3] }
 0x101   :  { %v893_v63 = vld [vmem:[#allocation0 + $0x1f8] sm:$0x3]  ;;  %990 = vst [vmem:[%s1483_s1 + $0x3e] sm:$0x3] %v701_v62 }
 0x102   :  { %1022 = vst [vmem:[%s1483_s1 + $0x7e] sm:$0x3] %v893_v63 }

// kernel: _lambda_.35
= control target key start
LH: loop header
LB: loop body
LE: loop exit
PB: predicated region body
PF: predicated region fallthrough
CT: control target
= control target key end

     0   :  { %vm12_vm0 = vcmask 1040384   ;;  %v57_v12 = vmov 1966171168   ;;  %v35_v14 = vlaneseq  ;;  %s83_s0 = inlined_call_operand.vmem [shape: f32[9,256], index: 0, kind: input, shape index: {}]   ;;  %s84_s1 = inlined_call_operand.vmem [shape: f32[1,256], index: 1, kind: output, shape index: {}]  }
   0x1   :  { %v8_v0 = vld [vmem:[%s83_s0] sm:$0xff]  ;;  %v9_v1 = vld [vmem:[%s83_s0 + $0x8] sm:$0xff]  ;;  %v10_v2 = vld [vmem:[%s83_s0 + $0x10] sm:$0x1]  ;;  %v33_v13 = vunpack.c.l.s4 %v57_v12 }
   0x2   :  { %v11_v3 = vld [vmem:[%s83_s0 + $0x18] sm:$0x1]  ;;  %v13_v4 = vsel %vm12_vm0, %v10_v2, -inf  ;;  %v36_v20 = vshrl.u32 %v35_v14, 7  ;;  %vm49_vm1 = vcmp.lt.s32.totalorder %v35_v14, 256 }
   0x3   :  { %v14_v5 = vmax.f32 %v8_v0, %v13_v4  ;;  %v21_v6 = vsel %vm12_vm0, %v11_v3, -inf  ;;  %v34_v19 = vunpack.c.0.s8 %v33_v13 }
   0x4   :  { %v22_v7 = vmax.f32 %v9_v1, %v21_v6 }
   0x5   :  { %v15_v8 = vrot.slane %v14_v5, 4  ;;  %v37_v25 = vsub.s32 %v34_v19, %v36_v20 }
   0x6   :  { %v23_v9 = vrot.slane %v22_v7, 4 }
   0x7   :  { %v16_v10 = vmax.f32 %v14_v5, %v15_v8 }
   0x8   :  { %v24_v11 = vmax.f32 %v22_v7, %v23_v9 }
   0x9   :  { %v17_v15 = vrot.slane %v16_v10, 2 }
   0xa   :  { %v25_v16 = vrot.slane %v24_v11, 2 }
   0xb   :  { %v18_v17 = vmax.f32 %v16_v10, %v17_v15 }
   0xc   :  { %v26_v18 = vmax.f32 %v24_v11, %v25_v16 }
   0xd   :  { %v19_v21 = vrot.slane %v18_v17, 1 }
   0xe   :  { %v27_v22 = vrot.slane %v26_v18, 1 }
   0xf   :  { %v20_v23 = vmax.f32 %v18_v17, %v19_v21 }
  0x10   :  { %v28_v24 = vmax.f32 %v26_v18, %v27_v22 }
  0x12   :  { %v31_v26 = vcombine.low %v20_v23, %v28_v24 }
  0x14   :  { %v38_v27 = vrot.slane %v31_v26, %v37_v25 }
  0x16   :  { %v45_v28 = vrot.slane %v38_v27, %v37_v25 }
  0x18   :  { %51 = vst.msk [vmem:[%s84_s1] sm:$0x3] %vm49_vm1, %v45_v28 }

// kernel: _lambda_.36
= control target key start
LH: loop header
LB: loop body
LE: loop exit
PB: predicated region body
PF: predicated region fallthrough
CT: control target
= control target key end

     0   :  { %v278_v1 = vmov 0   ;;  %vm107_vm0 = vcmask 1040384   ;;  %vm103_vm1 = vcmask 400384   ;;  %s367_s1 = inlined_call_operand.vmem [shape: bf16[49,512], index: 1, kind: input, shape index: {}]   ;;  %s368_s2 = inlined_call_operand.vmem [shape: f32[8,1], index: 2, kind: input, shape index: {}]   ;;  %s369_s3 = inlined_call_operand.vmem [shape: f32[8,1], index: 3, kind: input, shape index: {}]   ;;  %s370_s0 = inlined_call_operand.vmem [shape: bf16[8,49], index: 0, kind: input, shape index: {}]   ;;  %s371_s4 = inlined_call_operand.vmem [shape: f32[8,512], index: 4, kind: output, shape index: {}]  }
   0x1   :  { %v256_v0 = vld [vmem:[%s367_s1 + $0x4] ss:$16 sps:$4 sm:$0xff]   ;;  %154 = vmatprep.mubr.bf16.mxu0 %v278_v1  ;;  %195 = vmatprep.mubr.bf16.mxu1 %v278_v1  ;;  %v258_v2 = vld [vmem:[%s367_s1 + $0xc] ss:$16 sps:$4 sm:$0xff]   ;;  %v260_v3 = vld [vmem:[%s367_s1] ss:$16 sps:$4 sm:$0xff]  }
   0x2   :  { %255 = vset.pattern.permute.xlu0 %v278_v1  ;;  %122 = vmatprep.subr.bf16.mxu0 %v256_v0  ;;  %v261_v4 = vld [vmem:[%s367_s1 + $0x8] ss:$16 sps:$4 sm:$0xff]   ;;  %v262_v5 = vld [vmem:[%s367_s1 + $0x24] ss:$16 sps:$4 sm:$0xff]   ;;  %v264_v6 = vld [vmem:[%s367_s1 + $0x2c] ss:$16 sps:$4 sm:$0xff]  }
   0x3   :  { %163 = vmatprep.subr.bf16.mxu1 %v258_v2  ;;  %123 = vmatpush1.bf16.msra.mxu0 %v260_v3  ;;  %v266_v7 = vld [vmem:[%s367_s1 + $0x20] ss:$16 sps:$4 sm:$0xff]   ;;  %v267_v8 = vld [vmem:[%s367_s1 + $0x28] ss:$16 sps:$4 sm:$0xff]   ;;  %v268_v9 = vld [vmem:[%s367_s1 + $0x44] ss:$16 sps:$4 sm:$0xff]  }
   0x4   :  { %164 = vmatpush1.bf16.msra.mxu1 %v261_v4  ;;  %124 = vmatprep.subr.bf16.mxu0 %v262_v5  ;;  %v270_v10 = vld [vmem:[%s367_s1 + $0x4c] ss:$16 sps:$4 sm:$0xff]   ;;  %v272_v11 = vld [vmem:[%s367_s1 + $0x40] ss:$16 sps:$4 sm:$0xff]   ;;  %v109_v12 = vsel %vm107_vm0, 65535, %v278_v1 }
   0x5   :  { %165 = vmatprep.subr.bf16.mxu1 %v264_v6  ;;  %v273_v13 = vld [vmem:[%s367_s1 + $0x48] ss:$16 sps:$4 sm:$0xff]   ;;  %v30_v14 = vld [vmem:[%s367_s1 + $0x60] sm:$0x11] }
   0x6   :  { %v31_v15 = vld [vmem:[%s367_s1 + $0x68] sm:$0x11]  ;;  %v249_v16 = vcombine.high %v30_v14, %v30_v14  ;;  %v248_v18 = vcombine.low %v30_v14, %v30_v14  ;;  %v204_v19 = vld [vmem:[%s368_s2] sm:$0xff] }
   0x7   :  { %125 = vmatpush1.bf16.msra.mxu0 %v266_v7  ;;  %v251_v17 = vcombine.high %v31_v15, %v31_v15  ;;  %v250_v20 = vcombine.low %v31_v15, %v31_v15  ;;  %207 = vperm.xlu0 %255, %v204_v19   ;;  %v214_v23 = vld [vmem:[%s369_s3] sm:$0xff] }
   0x8   :  { %166 = vmatpush1.bf16.msra.mxu1 %v267_v8  ;;  %126 = vmatprep.subr.bf16.mxu0 %v268_v9  ;;  %v114_v21 = vand.u32 %v249_v16, %v109_v12  ;;  %v111_v24 = vand.u32 %v248_v18, %v109_v12  ;;  %v32_v26 = vld [vmem:[%s370_s0] sm:$0xf] }
   0x9   :  { %167 = vmatprep.subr.bf16.mxu1 %v270_v10  ;;  %v120_v22 = vand.u32 %v251_v17, %v109_v12  ;;  %v117_v25 = vand.u32 %v250_v20, %v109_v12 }
   0xb   :  { %127 = vmatpush1.bf16.msra.mxu0 %v272_v11  ;;  %217 = vperm.xlu0 %255, %v214_v23  }
   0xc   :  { %168 = vmatpush1.bf16.msra.mxu1 %v273_v13  ;;  %128 = vmatprep.subr.bf16.mxu0 %v114_v21 }
   0xd   :  { %169 = vmatprep.subr.bf16.mxu1 %v120_v22 }
   0xf   :  { %129 = vmatpush1.bf16.msra.mxu0 %v111_v24 }
  0x10   :  { %170 = vmatpush1.bf16.msra.mxu1 %v117_v25 }
  0x12   :  { %252 = vmatmul.mubr.msk.bf16.vlgmr.msra.gmra.mrb[0].mxu0 %vm103_vm1, %v32_v26 }
  0x13   :  { %253 = vmatmul.mubr.msk.bf16.vlgmr.msra.gmra.mrb[0].mxu1 %vm103_vm1, %v32_v26 }
  0x86   :  { %v208_v27 = vpop.permute.xlu0 %207 }
  0x8a   :  { %v218_v28 = vpop.permute.xlu0 %217 }
  0xe5   :  { %v156_v29 = vpop.f32.mrb[0].mxu0 }
  0xe6   :  { %v197_v30 = vpop.f32.mrb[0].mxu1  ;;  %v210_v31 = vmul.f32 %v208_v27, %v156_v29  ;;  %v158_v33 = vpop.f32.mrb[1].mxu0 }
  0xe7   :  { %v212_v32 = vmul.f32 %v208_v27, %v197_v30  ;;  %v199_v34 = vpop.f32.mrb[1].mxu1  ;;  %v211_v35 = vmul.f32 %v208_v27, %v158_v33  ;;  %v160_v37 = vpop.f32.mrb[2].mxu0 }
  0xe8   :  { %v213_v36 = vmul.f32 %v208_v27, %v199_v34  ;;  %v201_v38 = vpop.f32.mrb[2].mxu1  ;;  %v220_v39 = vadd.f32 %v218_v28, %v210_v31  ;;  %v161_v41 = vpop.f32.mrb[3].mxu0 }
  0xe9   :  { %v222_v40 = vadd.f32 %v218_v28, %v212_v32  ;;  %v202_v42 = vpop.f32.mrb[3].mxu1  ;;  %v221_v43 = vadd.f32 %v218_v28, %v211_v35 }
  0xea   :  { %v223_v44 = vadd.f32 %v218_v28, %v213_v36  ;;  %v224_v45 = vmax.f32 %v220_v39, 0.0 }
  0xeb   :  { %v226_v46 = vmax.f32 %v222_v40, 0.0  ;;  %v225_v47 = vmax.f32 %v221_v43, 0.0 }
  0xec   :  { %v227_v48 = vmax.f32 %v223_v44, 0.0  ;;  %228 = vst [vmem:[%s371_s4] sm:$0xff] %v224_v45 }
  0xed   :  { %230 = vst [vmem:[%s371_s4 + $0x10] sm:$0xff] %v226_v46  ;;  %229 = vst [vmem:[%s371_s4 + $0x8] sm:$0xff] %v225_v47 }
  0xee   :  { %231 = vst [vmem:[%s371_s4 + $0x18] sm:$0xff] %v227_v48 }

</bundles_post_ra>
